<compile_context>
chip_gen: v7x
topology: tpu7x:2x2x1
jax: 0.10.0
libtpu: 0.0.40
codegen_flags: <defaults>
</compile_context>

<pallas_src>
import functools

import numpy as np
import jax
import jax.numpy as jnp
from jax.experimental import pallas as pl
from jax.experimental.pallas import tpu as pltpu


# ----------------------------------------------------------------------------
# Pallas kernel: K-tiled GEMM with f32 accumulator + fused bias/residual/ReLU
# ----------------------------------------------------------------------------
def _gemm_kernel(*refs, relu, has_res):
    if has_res:
        p_ref, w_ref, b_ref, r_ref, o_ref, acc_ref = refs
    else:
        p_ref, w_ref, b_ref, o_ref, acc_ref = refs
        r_ref = None

    k_idx = pl.program_id(2)

    @pl.when(k_idx == 0)
    def _():
        acc_ref[...] = jnp.zeros_like(acc_ref)

    # bf16 x bf16 -> f32 accumulation on the MXU
    acc_ref[...] += jnp.dot(p_ref[...], w_ref[...],
                            preferred_element_type=jnp.float32)

    @pl.when(k_idx == pl.num_programs(2) - 1)
    def _():
        acc = acc_ref[...] + b_ref[...]            # bias in f32
        if has_res:
            acc = acc + r_ref[...].astype(jnp.float32)
        if relu:
            acc = jnp.maximum(acc, 0.0)
        o_ref[...] = acc.astype(o_ref.dtype)


def _pick_tm(m):
    for tm in (1024, 512, 256, 128, 64, 32, 16, 8):
        if m >= tm:
            return tm
    return max(m, 1)


def _pick_tk(k):
    if k <= 2304:
        return k
    for tk in (1536, 1280, 1152, 1024, 896, 768, 640, 512, 384, 256, 128):
        if k % tk == 0:
            return tk
    return k  # block dim == full array dim is always legal


def _im2col(x, kh, kw, stride, pad):
    # TODO(synk): patches are still materialized in HBM (bf16); a fully fused in-kernel
    #             shifted-slice conv (manual halo DMA) would remove this traffic entirely.
    b, h, w, c = x.shape
    if pad > 0:
        x = jnp.pad(x, ((0, 0), (pad, pad), (pad, pad), (0, 0)))
    ho = (h + 2 * pad - kh) // stride + 1
    wo = (w + 2 * pad - kw) // stride + 1
    cols = []
    for dy in range(kh):
        for dx in range(kw):
            cols.append(x[:, dy:dy + stride * (ho - 1) + 1:stride,
                          dx:dx + stride * (wo - 1) + 1:stride, :])
    return jnp.concatenate(cols, axis=-1), ho, wo


def conv2d_pallas(x, w, b, *, stride=1, pad=None, relu=True, residual=None,
                  out_dtype=jnp.bfloat16):
    """Conv2d(+bias)(+residual add)(+ReLU) as a K-tiled im2col GEMM in a Pallas TPU kernel.

    x: (B, H, W, Cin) NHWC (any float dtype; cast to bf16 for the MXU)
    w: (Cout, Cin, kh, kw)   (PyTorch conv weight layout)
    b: (Cout,)
    residual: optional (B, Ho, Wo, Cout), added before the ReLU (BasicBlock skip).
    """
    cout, cin, kh, kw = w.shape
    if pad is None:
        pad = kh // 2

    xb = x.astype(jnp.bfloat16)
    patches, ho, wo = _im2col(xb, kh, kw, stride, pad)
    bsz = x.shape[0]
    m = bsz * ho * wo
    k = kh * kw * cin

    p2 = patches.reshape(m, k)
    # (dy, dx, cin) ordering matches im2col concat order
    w2 = jnp.transpose(w, (2, 3, 1, 0)).reshape(k, cout).astype(jnp.bfloat16)
    b2 = b.reshape(1, cout).astype(jnp.float32)

    tm = _pick_tm(m)
    m_pad = ((m + tm - 1) // tm) * tm
    if m_pad != m:
        p2 = jnp.pad(p2, ((0, m_pad - m), (0, 0)))
    tn = cout if cout <= 256 else 256
    tk = _pick_tk(k)

    args = [p2, w2, b2]
    in_specs = [
        pl.BlockSpec((tm, tk), lambda i, j, kk: (i, kk)),   # patch tile (bf16)
        pl.BlockSpec((tk, tn), lambda i, j, kk: (kk, j)),   # weight tile (bf16)
        pl.BlockSpec((1, tn), lambda i, j, kk: (0, j)),     # bias row (f32)
    ]
    if residual is not None:
        r2 = residual.astype(jnp.bfloat16).reshape(m, cout)
        if m_pad != m:
            r2 = jnp.pad(r2, ((0, m_pad - m), (0, 0)))
        args.append(r2)
        in_specs.append(pl.BlockSpec((tm, tn), lambda i, j, kk: (i, j)))

    kern = functools.partial(_gemm_kernel, relu=relu, has_res=residual is not None)

    out = pl.pallas_call(
        kern,
        out_shape=jax.ShapeDtypeStruct((m_pad, cout), out_dtype),
        grid=(m_pad // tm, cout // tn, k // tk),
        in_specs=in_specs,
        out_specs=pl.BlockSpec((tm, tn), lambda i, j, kk: (i, j)),
        scratch_shapes=[pltpu.VMEM((tm, tn), jnp.float32)],
        compiler_params=pltpu.CompilerParams(
            dimension_semantics=("parallel", "parallel", "arbitrary"),
            vmem_limit_bytes=32 * 1024 * 1024,
        ),
    )(*args)

    if m_pad != m:
        out = out[:m]
    return out.reshape(bsz, ho, wo, cout)


# ----------------------------------------------------------------------------
# Glue ops (plain JAX)
# ----------------------------------------------------------------------------
def _maxpool3x3s2(x):
    # TODO(synk): 3x3/s2/p1 max-pool kept as lax.reduce_window glue, not a Pallas kernel.
    init = jnp.array(-jnp.inf, dtype=x.dtype)
    return jax.lax.reduce_window(
        x, init, jax.lax.max,
        window_dimensions=(1, 3, 3, 1),
        window_strides=(1, 2, 2, 1),
        padding=((0, 0), (1, 1), (1, 1), (0, 0)))


def _upsample2x_bilinear(x):
    # nn.Upsample(scale_factor=2, mode='bilinear', align_corners=True), NHWC input.
    # Expressed as two small dense interpolation-matrix contractions (no gathers).
    b, h, w, c = x.shape

    def interp_matrix(n_in, n_out):
        if n_in == 1:
            return jnp.ones((n_out, 1), jnp.float32)
        src = jnp.arange(n_out, dtype=jnp.float32) * ((n_in - 1) / (n_out - 1))
        i0 = jnp.clip(jnp.floor(src).astype(jnp.int32), 0, n_in - 2)
        frac = src - i0.astype(jnp.float32)
        cols = jnp.arange(n_in, dtype=jnp.int32)[None, :]
        mat = (jnp.where(cols == i0[:, None], (1.0 - frac)[:, None], 0.0)
               + jnp.where(cols == (i0 + 1)[:, None], frac[:, None], 0.0))
        return mat

    wy = interp_matrix(h, 2 * h)
    wx = interp_matrix(w, 2 * w)
    xf = x.astype(jnp.float32)
    y = jnp.einsum('oh,bhwc->bowc', wy, xf)
    y = jnp.einsum('pw,bowc->bopc', wx, y)
    return y.astype(x.dtype)


# ----------------------------------------------------------------------------
# Deterministic parameter construction (synthetic, no checkpoint load)
# ----------------------------------------------------------------------------
class _PInit:
    def __init__(self, seed=0):
        self._key = jax.random.PRNGKey(seed)

    def normal(self, shape, scale):
        self._key, k = jax.random.split(self._key)
        return scale * jax.random.normal(k, shape, jnp.float32)


def _conv_params(pi, cin, cout, k, bias=True):
    w = pi.normal((cout, cin, k, k), 1.0 / np.sqrt(cin * k * k))
    b = pi.normal((cout,), 0.01) if bias else None
    return {"w": w, "b": b}


def _bn_params(c):
    return {"g": jnp.ones((c,), jnp.float32), "b": jnp.zeros((c,), jnp.float32),
            "m": jnp.zeros((c,), jnp.float32), "v": jnp.ones((c,), jnp.float32)}


def _fold_bn(conv, bn, eps=1e-5):
    # inference-mode BatchNorm folded into the preceding conv
    scale = bn["g"] / jnp.sqrt(bn["v"] + eps)
    w = conv["w"] * scale[:, None, None, None]
    cb = conv["b"] if conv["b"] is not None else jnp.zeros((conv["w"].shape[0],), jnp.float32)
    b = (cb - bn["m"]) * scale + bn["b"]
    return w, b


def _fold_input_affine(w, b, scale, shift):
    """Fold conv(scale*x + shift) (per-input-channel affine) into conv'(x)."""
    w2 = w * scale.reshape(1, -1, 1, 1)
    b2 = b + jnp.einsum('oihw,i->o', w, shift)
    return w2, b2


def _basic_block_params(pi, cin, cout, stride):
    p = {
        "conv1": _conv_params(pi, cin, cout, 3, bias=False),
        "bn1": _bn_params(cout),
        "conv2": _conv_params(pi, cout, cout, 3, bias=False),
        "bn2": _bn_params(cout),
        "stride": stride,
    }
    if stride != 1 or cin != cout:
        p["ds_conv"] = _conv_params(pi, cin, cout, 1, bias=False)
        p["ds_bn"] = _bn_params(cout)
    return p


def init_resunet_params(seed=0, out_channels_0=64):
    pi = _PInit(seed)
    P = {}
    # ResNet18 stem + layers
    P["conv1"] = _conv_params(pi, 3, 64, 7, bias=False)
    P["bn1"] = _bn_params(64)
    P["layer1"] = [_basic_block_params(pi, 64, 64, 1), _basic_block_params(pi, 64, 64, 1)]
    P["layer2"] = [_basic_block_params(pi, 64, 128, 2), _basic_block_params(pi, 128, 128, 1)]
    P["layer3"] = [_basic_block_params(pi, 128, 256, 2), _basic_block_params(pi, 256, 256, 1)]
    P["layer4"] = [_basic_block_params(pi, 256, 512, 2), _basic_block_params(pi, 512, 512, 1)]
    # enc_translates in forward (reversed) order
    P["trans0a"] = _conv_params(pi, 3, 64, 3)      # Sequential(convrelu(3,64), convrelu(64,64))
    P["trans0b"] = _conv_params(pi, 64, 64, 3)
    P["trans1"] = _conv_params(pi, 64, 64, 1)
    P["trans2"] = _conv_params(pi, 64, 64, 1)
    P["trans3"] = _conv_params(pi, 128, 128, 1)
    P["trans4"] = _conv_params(pi, 256, 256, 1)
    P["trans5"] = _conv_params(pi, 512, 512, 1)
    # decoders (creation order)
    P["dec0"] = _conv_params(pi, 512 + 256, 256, 3)
    P["dec1"] = _conv_params(pi, 256 + 128, 128, 3)
    P["dec2"] = _conv_params(pi, 128 + 64, 64, 3)
    P["dec3"] = _conv_params(pi, 64 + 64, 64, 3)
    P["dec4"] = _conv_params(pi, 64 + 64, out_channels_0, 3)
    return P


# ----------------------------------------------------------------------------
# Forward pass
# ----------------------------------------------------------------------------
def _basic_block(x, p):
    w1, b1 = _fold_bn(p["conv1"], p["bn1"])
    h = conv2d_pallas(x, w1, b1, stride=p["stride"], pad=1, relu=True)
    if "ds_conv" in p:
        wd, bd = _fold_bn(p["ds_conv"], p["ds_bn"])
        identity = conv2d_pallas(x, wd, bd, stride=p["stride"], pad=0, relu=False)
    else:
        identity = x
    w2, b2 = _fold_bn(p["conv2"], p["bn2"])
    # relu(bn2(conv2(h)) + identity) fused into a single Pallas kernel
    return conv2d_pallas(h, w2, b2, stride=1, pad=1, relu=True, residual=identity)


def resunet_forward(P, x_nchw):
    # ImNormalizer (in_fmt='-11'): normalized = x * (0.5/std) + (0.5 - mean)/std.
    # Folded into the two convs that consume the raw input -> no elementwise passes here.
    mean = jnp.array([0.485, 0.456, 0.406], jnp.float32)
    std = jnp.array([0.229, 0.224, 0.225], jnp.float32)
    n_scale = 0.5 / std
    n_shift = (0.5 - mean) / std

    x = jnp.transpose(x_nchw, (0, 2, 3, 1))     # NCHW -> NHWC (raw [-1,1] input)
    x = x.astype(jnp.bfloat16)                  # bf16 activations throughout

    outs = []
    # enc_translates[0]: convrelu(3,64) -> convrelu(64,64) at full resolution
    w0, b0 = _fold_input_affine(P["trans0a"]["w"], P["trans0a"]["b"], n_scale, n_shift)
    t = conv2d_pallas(x, w0, b0, relu=True)
    t = conv2d_pallas(t, P["trans0b"]["w"], P["trans0b"]["b"], relu=True)
    outs.append(t)

    # enc 0: conv1 + bn1 + relu (stride 2), translate conv1x1(64,64)+relu
    w, b = _fold_bn(P["conv1"], P["bn1"])
    w, b = _fold_input_affine(w, b, n_scale, n_shift)
    x = conv2d_pallas(x, w, b, stride=2, pad=3, relu=True)
    outs.append(conv2d_pallas(x, P["trans1"]["w"], P["trans1"]["b"], pad=0, relu=True))

    # enc 1: maxpool + layer1, translate conv1x1(64,64)+relu
    x = _maxpool3x3s2(x)
    for bp in P["layer1"]:
        x = _basic_block(x, bp)
    outs.append(conv2d_pallas(x, P["trans2"]["w"], P["trans2"]["b"], pad=0, relu=True))

    # enc 2..4: layer2..layer4 with their 1x1 translates
    for lname, tname in (("layer2", "trans3"), ("layer3", "trans4"), ("layer4", "trans5")):
        for bp in P[lname]:
            x = _basic_block(x, bp)
        outs.append(conv2d_pallas(x, P[tname]["w"], P[tname]["b"], pad=0, relu=True))

    # decoder: cat(upsample(deepest), skip) -> convrelu
    # TODO(synk): the channel concat could be folded into the conv by splitting K into two
    #             accumulating GEMM segments; kept as an explicit (bf16) concat for simplicity.
    for dname in ("dec0", "dec1", "dec2", "dec3", "dec4"):
        x0 = outs.pop()
        x1 = outs.pop()
        x = jnp.concatenate([_upsample2x_bilinear(x0), x1], axis=-1)
        out_dtype = jnp.float32 if dname == "dec4" else jnp.bfloat16
        x = conv2d_pallas(x, P[dname]["w"], P[dname]["b"], relu=True, out_dtype=out_dtype)
        outs.append(x)
    x = outs.pop()
    # out_conv is None (out_channels=-1 default)
    return jnp.transpose(x, (0, 3, 1, 2))  # NHWC -> NCHW


# ----------------------------------------------------------------------------
if __name__ == "__main__":
    key = jax.random.PRNGKey(0)
    B, H, W = 2, 64, 64  # spatial must be divisible by 32 (depth=5 downsamplings)
    x = jax.random.uniform(key, (B, 3, H, W), jnp.float32, minval=-1.0, maxval=1.0)

    params = init_resunet_params(seed=0, out_channels_0=64)
    y = resunet_forward(params, x)
    y = jax.block_until_ready(y)

    assert y.shape == (B, 64, H, W), y.shape
    assert bool(jnp.all(jnp.isfinite(y)))
    print("KERNEL_OK")
</pallas_src>

<mosaic_0001>
module attributes {stable_mosaic.version = 11 : i64} {
  func.func @_gemm_kernel(%arg0: i32, %arg1: i32, %arg2: i32, %arg3: memref<1024x27xbf16, #tpu.memory_space<vmem>>, %arg4: memref<27x64xbf16, #tpu.memory_space<vmem>>, %arg5: memref<1x64xf32, #tpu.memory_space<vmem>>, %arg6: memref<1024x64xbf16, #tpu.memory_space<vmem>>, %arg7: memref<1024x64xf32, #tpu.memory_space<vmem>>) attributes {dimension_semantics = [#tpu.dimension_semantics<parallel>, #tpu.dimension_semantics<parallel>, #tpu.dimension_semantics<arbitrary>], iteration_bounds = array<i64: 8, 1, 1>, scalar_prefetch = 0 : i64, scratch_operands = 1 : i64, tpu.core_type = #tpu.core_type<tc>, window_params = [{transform_indices = @transform_0, window_bounds = array<i64: 1024, 27>}, {transform_indices = @transform_1, window_bounds = array<i64: 27, 64>}, {transform_indices = @transform_2, window_bounds = array<i64: 1, 64>}, {transform_indices = @transform_3, window_bounds = array<i64: 1024, 64>}]} {
    %c0_i32 = arith.constant 0 : i32
    %0 = arith.cmpi eq, %arg2, %c0_i32 : i32
    %1 = arith.extui %0 : i1 to i32
    %c0_i32_0 = arith.constant 0 : i32
    %2 = arith.cmpi ne, %1, %c0_i32_0 : i32
    scf.if %2 {
      %cst_10 = arith.constant 0.000000e+00 : f32
      %12 = vector.broadcast %cst_10 : f32 to vector<1024x64xf32>
      %c0_11 = arith.constant 0 : index
      %c0_12 = arith.constant 0 : index
      %13 = vector.load %arg7[%c0_11, %c0_12] : memref<1024x64xf32, #tpu.memory_space<vmem>>, vector<1024x64xf32>
      tpu.vector_store %arg7[%c0_11, %c0_12], %12 {strides = array<i32>} : memref<1024x64xf32, #tpu.memory_space<vmem>>, vector<1024x64xf32>,
    } else {
    }
    %c0 = arith.constant 0 : index
    %c0_1 = arith.constant 0 : index
    %3 = vector.load %arg7[%c0, %c0_1] : memref<1024x64xf32, #tpu.memory_space<vmem>>, vector<1024x64xf32>
    %c0_2 = arith.constant 0 : index
    %c0_3 = arith.constant 0 : index
    %4 = vector.load %arg3[%c0_2, %c0_3] : memref<1024x27xbf16, #tpu.memory_space<vmem>>, vector<1024x27xbf16>
    %c0_4 = arith.constant 0 : index
    %c0_5 = arith.constant 0 : index
    %5 = vector.load %arg4[%c0_4, %c0_5] : memref<27x64xbf16, #tpu.memory_space<vmem>>, vector<27x64xbf16>
    %cst = arith.constant dense<0.000000e+00> : vector<1024x64xf32>
    %6 = tpu.matmul %4, %5, %cst {dimension_numbers = #tpu.dot_dimension_numbers<[1], [0], [0], [1], [0, 0, 1, 1], [], []>} : vector<1024x27xbf16>, vector<27x64xbf16>, vector<1024x64xf32> -> vector<1024x64xf32>
    %7 = arith.addf %3, %6 : vector<1024x64xf32>
    %c0_6 = arith.constant 0 : index
    %c0_7 = arith.constant 0 : index
    %8 = vector.load %arg7[%c0_6, %c0_7] : memref<1024x64xf32, #tpu.memory_space<vmem>>, vector<1024x64xf32>
    tpu.vector_store %arg7[%c0_6, %c0_7], %7 {strides = array<i32>} : memref<1024x64xf32, #tpu.memory_space<vmem>>, vector<1024x64xf32>,
    %c0_i32_8 = arith.constant 0 : i32
    %9 = arith.cmpi eq, %arg2, %c0_i32_8 : i32
    %10 = arith.extui %9 : i1 to i32
    %c0_i32_9 = arith.constant 0 : i32
    %11 = arith.cmpi ne, %10, %c0_i32_9 : i32
    scf.if %11 {
      %c0_10 = arith.constant 0 : index
      %c0_11 = arith.constant 0 : index
      %12 = vector.load %arg7[%c0_10, %c0_11] : memref<1024x64xf32, #tpu.memory_space<vmem>>, vector<1024x64xf32>
      %c0_12 = arith.constant 0 : index
      %c0_13 = arith.constant 0 : index
      %13 = vector.load %arg5[%c0_12, %c0_13] : memref<1x64xf32, #tpu.memory_space<vmem>>, vector<1x64xf32>
      %14 = vector.broadcast %13 : vector<1x64xf32> to vector<1024x64xf32>
      %15 = arith.addf %12, %14 : vector<1024x64xf32>
      %cst_14 = arith.constant 0.000000e+00 : f32
      %16 = vector.broadcast %cst_14 : f32 to vector<1024x64xf32>
      %17 = arith.maximumf %15, %16 : vector<1024x64xf32>
      %18 = arith.truncf %17 : vector<1024x64xf32> to vector<1024x64xbf16>
      %c0_15 = arith.constant 0 : index
      %c0_16 = arith.constant 0 : index
      %19 = vector.load %arg6[%c0_15, %c0_16] : memref<1024x64xbf16, #tpu.memory_space<vmem>>, vector<1024x64xbf16>
      tpu.vector_store %arg6[%c0_15, %c0_16], %18 {strides = array<i32>} : memref<1024x64xbf16, #tpu.memory_space<vmem>>, vector<1024x64xbf16>,
    } else {
    }
    return
  }
  func.func @transform_0(%arg0: i32, %arg1: i32, %arg2: i32) -> (i32, i32) {
    %c0_i32 = arith.constant 0 : i32
    return %arg0, %arg2 : i32, i32
  }
  func.func @transform_1(%arg0: i32, %arg1: i32, %arg2: i32) -> (i32, i32) {
    %c0_i32 = arith.constant 0 : i32
    return %arg2, %arg1 : i32, i32
  }
  func.func @transform_2(%arg0: i32, %arg1: i32, %arg2: i32) -> (i32, i32) {
    %c0_i32 = arith.constant 0 : i32
    %c0_i32_0 = arith.constant 0 : i32
    return %c0_i32, %arg1 : i32, i32
  }
  func.func @transform_3(%arg0: i32, %arg1: i32, %arg2: i32) -> (i32, i32) {
    %c0_i32 = arith.constant 0 : i32
    return %arg0, %arg1 : i32, i32
  }
}

</mosaic_0001>

<bundles_post_ra>
// kernel: tpu_custom_call.1
= control target key start
LH: loop header
LB: loop body
LE: loop exit
PB: predicated region body
PF: predicated region fallthrough
CT: control target
= control target key end

     0   :  { %s3874_s12 = smov 0   ;;  %s3876_s13 = smov 0   ;;  %s4841_s0 = inlined_call_operand.vmem [shape: bf16[8192,27], index: 0, kind: input, shape index: {}]   ;;  %s4842_s1 = inlined_call_operand.vmem [shape: bf16[27,64], index: 1, kind: input, shape index: {}]   ;;  %s4843_s2 = inlined_call_operand.vmem [shape: f32[1,64], index: 2, kind: input, shape index: {}]   ;;  %s4844_s3 = inlined_call_operand.vmem [shape: bf16[8192,64], index: 3, kind: output, shape index: {}]  }
   0x1   :  { %s3878_s14 = smov 0  }
   0x2 LB: > { %s32_s15 = sadd.s32 1, %s3846_s13  ;;  %p3138_p0 = scmp.ge.s32.totalorder %s3850_s14, 1  ;;  %s3850_s14 = sphi %s3878_s14, %s13_s14   ;;  %s3846_s13 = sphi %s3876_s13, %s4846_s13   ;;  %s3842_s12 = sphi %s3874_s12, %s4845_s12  }
   0x3   : > { %p34_p1 = scmp.ge.s32.totalorder %s32_s15, 8  ;;  %p188_p2 = scmp.lt.s32.totalorder %s3850_s14, 9 }
   0x5   : > { %s4848_s15 = smov (%p34_p1, %s32_s15), 0  ;;  %p189_p3 = pnand %p3138_p0, %p188_p2 }
   0x6   : > { %v3760_v0 = vld [vmem:[%s4842_s1] sm:$0xff] (!%p189_p3)   ;;  %vm1177_vm0 = vcmask (!%p189_p3), 1044480   ;;  %v3761_v1 = vld [vmem:[%s4842_s1 + $0x8] sm:$0x3f] (!%p189_p3)   ;;  %vm1178_vm1 = vcmask (!%p189_p3), 1045504   ;;  %s3139_s20 = sshll.u32 (!%p189_p3), %s3842_s12, 7 }
   0x7   : > { %192 = sbr.rel (%p189_p3) target bundleno = 395 (0x18b), region = 32  ;;  %3598 = vmatprep.subr.bf16.mxu0 (!%p189_p3), %v3760_v0  ;;  %3730 = vmatprep.subr.bf16.mxu1 (!%p189_p3), %v3760_v0  ;;  %v3852_v2 = vmov (!%p189_p3), 65535   ;;  %p230_p4 = scmp.lt.s32.totalorder (!%p189_p3), %s3139_s20, 1023  ;;  %vm264_vm2 = vcmask (!%p189_p3), 523264   ;;  %v3853_v6 = vmov (!%p189_p3), 0.0   ;;  %vm984_vm3 = vcmask (!%p189_p3), 220160  }
   0x8   : > { %3599 = vmatpush3.bf16.msra.mxu0 (!%p189_p3), %v3760_v0  ;;  %3732 = vmatpush3.bf16.msra.mxu1 (!%p189_p3), %v3760_v0  ;;  %v1179_v3 = vsel (!%p189_p3), %vm1177_vm0, 4294967295, %v3852_v2  ;;  %267 = vst.msk [vmem:[#allocation2 + $0x10] sm:$0xff] (!%p189_p3), %vm264_vm2, %v3853_v6  ;;  %265 = vst.msk [vmem:[#allocation2] sm:$0xff] (!%p189_p3), %vm264_vm2, %v3853_v6  ;;  %vm2892_vm4 = vcmask (!%p189_p3), 519168  }
   0x9   : > { %v1180_v4 = vsel (!%p189_p3), %vm1178_vm1, %v1179_v3, 0  ;;  %266 = vst.msk [vmem:[#allocation2 + $0x8] sm:$0xff] (!%p189_p3), %vm264_vm2, %v3853_v6  ;;  %268 = vst.msk [vmem:[#allocation2 + $0x18] sm:$0xff] (!%p189_p3), %vm264_vm2, %v3853_v6 }
   0xa   : > { %v3898_v5 = vand.u32 (!%p189_p3), %v3761_v1, %v1180_v4  ;;  %269 = vst.msk [vmem:[#allocation2 + $0x20] sm:$0xff] (!%p189_p3), %vm264_vm2, %v3853_v6  ;;  %270 = vst.msk [vmem:[#allocation2 + $0x28] sm:$0xff] (!%p189_p3), %vm264_vm2, %v3853_v6 }
   0xb   : > { %271 = vst.msk [vmem:[#allocation2 + $0x30] sm:$0xff] (!%p189_p3), %vm264_vm2, %v3853_v6  ;;  %272 = vst.msk [vmem:[#allocation2 + $0x38] sm:$0xff] (!%p189_p3), %vm264_vm2, %v3853_v6 }
   0xc   : > { %3600 = vmatprep.subr.bf16.mxu0 (!%p189_p3), %v3898_v5  ;;  %3731 = vmatprep.subr.bf16.mxu1 (!%p189_p3), %v3898_v5  ;;  %273 = vst.msk [vmem:[#allocation2 + $0x40] sm:$0xff] (!%p189_p3), %vm264_vm2, %v3853_v6  ;;  %274 = vst.msk [vmem:[#allocation2 + $0x48] sm:$0xff] (!%p189_p3), %vm264_vm2, %v3853_v6 }
   0xd   : > { %275 = vst.msk [vmem:[#allocation2 + $0x50] sm:$0xff] (!%p189_p3), %vm264_vm2, %v3853_v6  ;;  %276 = vst.msk [vmem:[#allocation2 + $0x58] sm:$0xff] (!%p189_p3), %vm264_vm2, %v3853_v6  ;;  %3601 = vmatpush3.bf16.msra.mxu0 (!%p189_p3), %v3898_v5  ;;  %3733 = vmatpush3.bf16.msra.mxu1 (!%p189_p3), %v3898_v5 }
   0xe   : > { %s4850_s20 = smov (!%p230_p4, %s3139_s20), 1023  ;;  %277 = vst.msk [vmem:[#allocation2 + $0x60] sm:$0xff] %vm264_vm2, %v3853_v6  ;;  %278 = vst.msk [vmem:[#allocation2 + $0x68] sm:$0xff] %vm264_vm2, %v3853_v6 }
   0xf   : > { %s3140_s21 = sshll.u32 %s4850_s20, 2  ;;  %279 = vst.msk [vmem:[#allocation2 + $0x70] sm:$0xff] %vm264_vm2, %v3853_v6  ;;  %280 = vst.msk [vmem:[#allocation2 + $0x78] sm:$0xff] %vm264_vm2, %v3853_v6 }
  0x10   : > { %281 = vst.msk [vmem:[#allocation2 + $0x80] sm:$0xff] %vm264_vm2, %v3853_v6  ;;  %282 = vst.msk [vmem:[#allocation2 + $0x88] sm:$0xff] %vm264_vm2, %v3853_v6  ;;  %s4168_s24 = scalar_lea.vmem %s4841_s0, %s3140_s21  ;;  %s4326_s29 = scalar_lea.vmem %s4844_s3, %s3140_s21 }
  0x11   : > { %283 = vst.msk [vmem:[#allocation2 + $0x90] sm:$0xff] %vm264_vm2, %v3853_v6  ;;  %284 = vst.msk [vmem:[#allocation2 + $0x98] sm:$0xff] %vm264_vm2, %v3853_v6  ;;  %v3762_v7 = vld [vmem:[%s4168_s24] sm:$0xff]   ;;  %v3764_v9 = vld [vmem:[%s4168_s24 + $0x8] sm:$0xff]  }
  0x12   : > { %285 = vst.msk [vmem:[#allocation2 + $0xa0] sm:$0xff] %vm264_vm2, %v3853_v6  ;;  %286 = vst.msk [vmem:[#allocation2 + $0xa8] sm:$0xff] %vm264_vm2, %v3853_v6  ;;  %v3763_v8 = vld [vmem:[%s4168_s24 + $0x100] sm:$0xff]   ;;  %3602 = vmatprep.mubr.msk.bf16.mxu0 %vm984_vm3, %v3762_v7  ;;  %v3765_v10 = vld [vmem:[%s4168_s24 + $0x108] sm:$0xff]  }
  0x13   : > { %287 = vst.msk [vmem:[#allocation2 + $0xb0] sm:$0xff] %vm264_vm2, %v3853_v6  ;;  %288 = vst.msk [vmem:[#allocation2 + $0xb8] sm:$0xff] %vm264_vm2, %v3853_v6  ;;  %3666 = vmatprep.mubr.msk.bf16.mxu1 %vm984_vm3, %v3763_v8  ;;  %3603 = vmatmul.mubr.msk.bf16.vlgmr.msra.gmra.mrb[0].mxu0 %vm984_vm3, %v3764_v9  ;;  %v3766_v11 = vld [vmem:[%s4168_s24 + $0x10] sm:$0xff]   ;;  %v3768_v13 = vld [vmem:[%s4168_s24 + $0x18] sm:$0xff]  }
  0x14   : > { %289 = vst.msk [vmem:[#allocation2 + $0xc0] sm:$0xff] %vm264_vm2, %v3853_v6  ;;  %290 = vst.msk [vmem:[#allocation2 + $0xc8] sm:$0xff] %vm264_vm2, %v3853_v6  ;;  %3667 = vmatmul.mubr.msk.bf16.vlgmr.msra.gmra.mrb[0].mxu1 %vm984_vm3, %v3765_v10  ;;  %v3767_v12 = vld [vmem:[%s4168_s24 + $0x110] sm:$0xff]   ;;  %3606 = vmatprep.mubr.msk.bf16.mxu0 %vm984_vm3, %v3766_v11  ;;  %v3769_v14 = vld [vmem:[%s4168_s24 + $0x118] sm:$0xff]  }
  0x15   : > { %291 = vst.msk [vmem:[#allocation2 + $0xd0] sm:$0xff] %vm264_vm2, %v3853_v6  ;;  %292 = vst.msk [vmem:[#allocation2 + $0xd8] sm:$0xff] %vm264_vm2, %v3853_v6  ;;  %3670 = vmatprep.mubr.msk.bf16.mxu1 %vm984_vm3, %v3767_v12  ;;  %v3770_v15 = vld [vmem:[%s4168_s24 + $0x20] sm:$0xff]   ;;  %v3772_v17 = vld [vmem:[%s4168_s24 + $0x28] sm:$0xff]  }
  0x16   : > { %293 = vst.msk [vmem:[#allocation2 + $0xe0] sm:$0xff] %vm264_vm2, %v3853_v6  ;;  %294 = vst.msk [vmem:[#allocation2 + $0xe8] sm:$0xff] %vm264_vm2, %v3853_v6  ;;  %v3771_v16 = vld [vmem:[%s4168_s24 + $0x120] sm:$0xff]   ;;  %v3773_v18 = vld [vmem:[%s4168_s24 + $0x128] sm:$0xff]  }
  0x17   : > { %295 = vst.msk [vmem:[#allocation2 + $0xf0] sm:$0xff] %vm264_vm2, %v3853_v6  ;;  %296 = vst.msk [vmem:[#allocation2 + $0xf8] sm:$0xff] %vm264_vm2, %v3853_v6  ;;  %v3774_v19 = vld [vmem:[%s4168_s24 + $0x30] sm:$0xff]   ;;  %v3776_v21 = vld [vmem:[%s4168_s24 + $0x38] sm:$0xff]  }
  0x18   : > { %297 = vst.msk [vmem:[#allocation2 + $0x100] sm:$0xff] %vm264_vm2, %v3853_v6  ;;  %298 = vst.msk [vmem:[#allocation2 + $0x108] sm:$0xff] %vm264_vm2, %v3853_v6  ;;  %v3775_v20 = vld [vmem:[%s4168_s24 + $0x130] sm:$0xff]   ;;  %v3777_v22 = vld [vmem:[%s4168_s24 + $0x138] sm:$0xff]  }
  0x19   : > { %299 = vst.msk [vmem:[#allocation2 + $0x110] sm:$0xff] %vm264_vm2, %v3853_v6  ;;  %300 = vst.msk [vmem:[#allocation2 + $0x118] sm:$0xff] %vm264_vm2, %v3853_v6  ;;  %v3778_v23 = vld [vmem:[%s4168_s24 + $0x40] sm:$0xff]   ;;  %v3780_v25 = vld [vmem:[%s4168_s24 + $0x48] sm:$0xff]  }
  0x1a   : > { %301 = vst.msk [vmem:[#allocation2 + $0x120] sm:$0xff] %vm264_vm2, %v3853_v6  ;;  %302 = vst.msk [vmem:[#allocation2 + $0x128] sm:$0xff] %vm264_vm2, %v3853_v6  ;;  %v3779_v24 = vld [vmem:[%s4168_s24 + $0x140] sm:$0xff]   ;;  %v3781_v26 = vld [vmem:[%s4168_s24 + $0x148] sm:$0xff]  }
  0x1b   : > { %303 = vst.msk [vmem:[#allocation2 + $0x130] sm:$0xff] %vm264_vm2, %v3853_v6  ;;  %304 = vst.msk [vmem:[#allocation2 + $0x138] sm:$0xff] %vm264_vm2, %v3853_v6  ;;  %3607 = vmatmul.mubr.msk.bf16.gmra.mrb[4].mxu0 %vm984_vm3, %v3768_v13  ;;  %v3782_v27 = vld [vmem:[%s4168_s24 + $0x50] sm:$0xff]   ;;  %v3784_v29 = vld [vmem:[%s4168_s24 + $0x58] sm:$0xff]  }
  0x1c   : > { %305 = vst.msk [vmem:[#allocation2 + $0x140] sm:$0xff] %vm264_vm2, %v3853_v6  ;;  %306 = vst.msk [vmem:[#allocation2 + $0x148] sm:$0xff] %vm264_vm2, %v3853_v6  ;;  %3671 = vmatmul.mubr.msk.bf16.gmra.mrb[4].mxu1 %vm984_vm3, %v3769_v14  ;;  %3610 = vmatprep.mubr.msk.bf16.mxu0 %vm984_vm3, %v3770_v15  ;;  %v3783_v28 = vld [vmem:[%s4168_s24 + $0x150] sm:$0xff]   ;;  %v3785_v30 = vld [vmem:[%s4168_s24 + $0x158] sm:$0xff]  }
  0x1d   : > { %307 = vst.msk [vmem:[#allocation2 + $0x150] sm:$0xff] %vm264_vm2, %v3853_v6  ;;  %308 = vst.msk [vmem:[#allocation2 + $0x158] sm:$0xff] %vm264_vm2, %v3853_v6  ;;  %3674 = vmatprep.mubr.msk.bf16.mxu1 %vm984_vm3, %v3771_v16  ;;  %v3786_v31 = vld [vmem:[%s4168_s24 + $0x60] sm:$0xff]   ;;  %v3788_v33 = vld [vmem:[%s4168_s24 + $0x68] sm:$0xff]  }
  0x1e   : > { %309 = vst.msk [vmem:[#allocation2 + $0x160] sm:$0xff] %vm264_vm2, %v3853_v6  ;;  %310 = vst.msk [vmem:[#allocation2 + $0x168] sm:$0xff] %vm264_vm2, %v3853_v6  ;;  %v3787_v32 = vld [vmem:[%s4168_s24 + $0x160] sm:$0xff]   ;;  %v3789_v34 = vld [vmem:[%s4168_s24 + $0x168] sm:$0xff]  }
  0x1f   : > { %311 = vst.msk [vmem:[#allocation2 + $0x170] sm:$0xff] %vm264_vm2, %v3853_v6  ;;  %312 = vst.msk [vmem:[#allocation2 + $0x178] sm:$0xff] %vm264_vm2, %v3853_v6  ;;  %v3790_v35 = vld [vmem:[%s4168_s24 + $0x70] sm:$0xff]   ;;  %v3792_v37 = vld [vmem:[%s4168_s24 + $0x78] sm:$0xff]  }
  0x20   : > { %313 = vst.msk [vmem:[#allocation2 + $0x180] sm:$0xff] %vm264_vm2, %v3853_v6  ;;  %314 = vst.msk [vmem:[#allocation2 + $0x188] sm:$0xff] %vm264_vm2, %v3853_v6  ;;  %v3791_v36 = vld [vmem:[%s4168_s24 + $0x170] sm:$0xff]   ;;  %v3793_v38 = vld [vmem:[%s4168_s24 + $0x178] sm:$0xff]  }
  0x21   : > { %315 = vst.msk [vmem:[#allocation2 + $0x190] sm:$0xff] %vm264_vm2, %v3853_v6  ;;  %316 = vst.msk [vmem:[#allocation2 + $0x198] sm:$0xff] %vm264_vm2, %v3853_v6  ;;  %v3794_v39 = vld [vmem:[%s4168_s24 + $0x80] sm:$0xff]   ;;  %v3796_v41 = vld [vmem:[%s4168_s24 + $0x88] sm:$0xff]  }
  0x22   : > { %317 = vst.msk [vmem:[#allocation2 + $0x1a0] sm:$0xff] %vm264_vm2, %v3853_v6  ;;  %318 = vst.msk [vmem:[#allocation2 + $0x1a8] sm:$0xff] %vm264_vm2, %v3853_v6  ;;  %v3795_v40 = vld [vmem:[%s4168_s24 + $0x180] sm:$0xff]   ;;  %v3797_v42 = vld [vmem:[%s4168_s24 + $0x188] sm:$0xff]  }
  0x23   : > { %319 = vst.msk [vmem:[#allocation2 + $0x1b0] sm:$0xff] %vm264_vm2, %v3853_v6  ;;  %320 = vst.msk [vmem:[#allocation2 + $0x1b8] sm:$0xff] %vm264_vm2, %v3853_v6  ;;  %3611 = vmatmul.mubr.msk.bf16.gmra.mrb[8].mxu0 %vm984_vm3, %v3772_v17  ;;  %v3798_v43 = vld [vmem:[%s4168_s24 + $0x90] sm:$0xff]   ;;  %v3800_v45 = vld [vmem:[%s4168_s24 + $0x98] sm:$0xff]  }
  0x24   : > { %321 = vst.msk [vmem:[#allocation2 + $0x1c0] sm:$0xff] %vm264_vm2, %v3853_v6  ;;  %322 = vst.msk [vmem:[#allocation2 + $0x1c8] sm:$0xff] %vm264_vm2, %v3853_v6  ;;  %3675 = vmatmul.mubr.msk.bf16.gmra.mrb[8].mxu1 %vm984_vm3, %v3773_v18  ;;  %3614 = vmatprep.mubr.msk.bf16.mxu0 %vm984_vm3, %v3774_v19  ;;  %v3799_v44 = vld [vmem:[%s4168_s24 + $0x190] sm:$0xff]   ;;  %v3801_v46 = vld [vmem:[%s4168_s24 + $0x198] sm:$0xff]  }
  0x25   : > { %323 = vst.msk [vmem:[#allocation2 + $0x1d0] sm:$0xff] %vm264_vm2, %v3853_v6  ;;  %324 = vst.msk [vmem:[#allocation2 + $0x1d8] sm:$0xff] %vm264_vm2, %v3853_v6  ;;  %3678 = vmatprep.mubr.msk.bf16.mxu1 %vm984_vm3, %v3775_v20  ;;  %v3802_v47 = vld [vmem:[%s4168_s24 + $0xa0] sm:$0xff]   ;;  %v3804_v49 = vld [vmem:[%s4168_s24 + $0xa8] sm:$0xff]  }
  0x26   : > { %325 = vst.msk [vmem:[#allocation2 + $0x1e0] sm:$0xff] %vm264_vm2, %v3853_v6  ;;  %326 = vst.msk [vmem:[#allocation2 + $0x1e8] sm:$0xff] %vm264_vm2, %v3853_v6  ;;  %v3803_v48 = vld [vmem:[%s4168_s24 + $0x1a0] sm:$0xff]   ;;  %v3805_v50 = vld [vmem:[%s4168_s24 + $0x1a8] sm:$0xff]  }
  0x27   : > { %327 = vst.msk [vmem:[#allocation2 + $0x1f0] sm:$0xff] %vm264_vm2, %v3853_v6  ;;  %328 = vst.msk [vmem:[#allocation2 + $0x1f8] sm:$0xff] %vm264_vm2, %v3853_v6  ;;  %v3806_v51 = vld [vmem:[%s4168_s24 + $0xb0] sm:$0xff]   ;;  %v3808_v53 = vld [vmem:[%s4168_s24 + $0xb8] sm:$0xff]  }
  0x28   : > { %329 = vst.msk [vmem:[#allocation2 + $0x200] sm:$0xff] %vm264_vm2, %v3853_v6  ;;  %330 = vst.msk [vmem:[#allocation2 + $0x208] sm:$0xff] %vm264_vm2, %v3853_v6  ;;  %v3807_v52 = vld [vmem:[%s4168_s24 + $0x1b0] sm:$0xff]   ;;  %v3809_v54 = vld [vmem:[%s4168_s24 + $0x1b8] sm:$0xff]  }
  0x29   : > { %331 = vst.msk [vmem:[#allocation2 + $0x210] sm:$0xff] %vm264_vm2, %v3853_v6  ;;  %332 = vst.msk [vmem:[#allocation2 + $0x218] sm:$0xff] %vm264_vm2, %v3853_v6  ;;  %v3810_v55 = vld [vmem:[%s4168_s24 + $0xc0] sm:$0xff]   ;;  %v3812_v57 = vld [vmem:[%s4168_s24 + $0xc8] sm:$0xff]  }
  0x2a   : > { %333 = vst.msk [vmem:[#allocation2 + $0x220] sm:$0xff] %vm264_vm2, %v3853_v6  ;;  %334 = vst.msk [vmem:[#allocation2 + $0x228] sm:$0xff] %vm264_vm2, %v3853_v6  ;;  %v3811_v56 = vld [vmem:[%s4168_s24 + $0x1c0] sm:$0xff]   ;;  %v3813_v58 = vld [vmem:[%s4168_s24 + $0x1c8] sm:$0xff]  }
  0x2b   : > { %335 = vst.msk [vmem:[#allocation2 + $0x230] sm:$0xff] %vm264_vm2, %v3853_v6  ;;  %336 = vst.msk [vmem:[#allocation2 + $0x238] sm:$0xff] %vm264_vm2, %v3853_v6  ;;  %3615 = vmatmul.mubr.msk.bf16.gmra.mrb[12].mxu0 %vm984_vm3, %v3776_v21  ;;  %v3814_v59 = vld [vmem:[%s4168_s24 + $0xd0] sm:$0xff]   ;;  %v3816_v61 = vld [vmem:[%s4168_s24 + $0xd8] sm:$0xff]  }
  0x2c   : > { %337 = vst.msk [vmem:[#allocation2 + $0x240] sm:$0xff] %vm264_vm2, %v3853_v6  ;;  %338 = vst.msk [vmem:[#allocation2 + $0x248] sm:$0xff] %vm264_vm2, %v3853_v6  ;;  %3679 = vmatmul.mubr.msk.bf16.gmra.mrb[12].mxu1 %vm984_vm3, %v3777_v22  ;;  %3618 = vmatprep.mubr.msk.bf16.mxu0 %vm984_vm3, %v3778_v23  ;;  %v3815_v60 = vld [vmem:[%s4168_s24 + $0x1d0] sm:$0xff]   ;;  %v3817_v62 = vld [vmem:[%s4168_s24 + $0x1d8] sm:$0xff]  }
  0x2d   : > { %339 = vst.msk [vmem:[#allocation2 + $0x250] sm:$0xff] %vm264_vm2, %v3853_v6  ;;  %340 = vst.msk [vmem:[#allocation2 + $0x258] sm:$0xff] %vm264_vm2, %v3853_v6  ;;  %3682 = vmatprep.mubr.msk.bf16.mxu1 %vm984_vm3, %v3779_v24  ;;  %v3818_v63 = vld [vmem:[%s4168_s24 + $0xe0] sm:$0xff]   ;;  %v3820_v1 = vld [vmem:[%s4168_s24 + $0xe8] sm:$0xff]  }
  0x2e   : > { %341 = vst.msk [vmem:[#allocation2 + $0x260] sm:$0xff] %vm264_vm2, %v3853_v6  ;;  %342 = vst.msk [vmem:[#allocation2 + $0x268] sm:$0xff] %vm264_vm2, %v3853_v6  ;;  %v3819_v0 = vld [vmem:[%s4168_s24 + $0x1e0] sm:$0xff]   ;;  %v3821_v2 = vld [vmem:[%s4168_s24 + $0x1e8] sm:$0xff]  }
  0x2f   : > { %343 = vst.msk [vmem:[#allocation2 + $0x270] sm:$0xff] %vm264_vm2, %v3853_v6  ;;  %344 = vst.msk [vmem:[#allocation2 + $0x278] sm:$0xff] %vm264_vm2, %v3853_v6  ;;  %v3822_v3 = vld [vmem:[%s4168_s24 + $0xf0] sm:$0xff]   ;;  %v3824_v5 = vld [vmem:[%s4168_s24 + $0xf8] sm:$0xff]  }
  0x30   : > { %345 = vst.msk [vmem:[#allocation2 + $0x280] sm:$0xff] %vm264_vm2, %v3853_v6  ;;  %346 = vst.msk [vmem:[#allocation2 + $0x288] sm:$0xff] %vm264_vm2, %v3853_v6  ;;  %v3823_v4 = vld [vmem:[%s4168_s24 + $0x1f0] sm:$0xff]   ;;  %v393_v9 = vld [vmem:[#allocation2] sm:$0xff] }
  0x31   : > { %347 = vst.msk [vmem:[#allocation2 + $0x290] sm:$0xff] %vm264_vm2, %v3853_v6  ;;  %348 = vst.msk [vmem:[#allocation2 + $0x298] sm:$0xff] %vm264_vm2, %v3853_v6  ;;  %v395_v7 = vld [vmem:[#allocation2 + $0x10] sm:$0xff]  ;;  %v457_v11 = vld [vmem:[#allocation2 + $0x200] sm:$0xff] }
  0x32   : > { %349 = vst.msk [vmem:[#allocation2 + $0x2a0] sm:$0xff] %vm264_vm2, %v3853_v6  ;;  %350 = vst.msk [vmem:[#allocation2 + $0x2a8] sm:$0xff] %vm264_vm2, %v3853_v6  ;;  %v459_v8 = vld [vmem:[#allocation2 + $0x210] sm:$0xff]  ;;  %v396_v12 = vld [vmem:[#allocation2 + $0x18] sm:$0xff] }
  0x33   : > { %351 = vst.msk [vmem:[#allocation2 + $0x2b0] sm:$0xff] %vm264_vm2, %v3853_v6  ;;  %352 = vst.msk [vmem:[#allocation2 + $0x2b8] sm:$0xff] %vm264_vm2, %v3853_v6  ;;  %3619 = vmatmul.mubr.msk.bf16.gmra.mrb[16].mxu0 %vm984_vm3, %v3780_v25  ;;  %v460_v16 = vld [vmem:[#allocation2 + $0x218] sm:$0xff]  ;;  %v394_v17 = vld [vmem:[#allocation2 + $0x8] sm:$0xff] }
  0x34   : > { %353 = vst.msk [vmem:[#allocation2 + $0x2c0] sm:$0xff] %vm264_vm2, %v3853_v6  ;;  %354 = vst.msk [vmem:[#allocation2 + $0x2c8] sm:$0xff] %vm264_vm2, %v3853_v6  ;;  %3683 = vmatmul.mubr.msk.bf16.gmra.mrb[16].mxu1 %vm984_vm3, %v3781_v26  ;;  %3622 = vmatprep.mubr.msk.bf16.mxu0 %vm984_vm3, %v3782_v27  ;;  %v458_v22 = vld [vmem:[#allocation2 + $0x208] sm:$0xff] }
  0x35   : > { %355 = vst.msk [vmem:[#allocation2 + $0x2d0] sm:$0xff] %vm264_vm2, %v3853_v6  ;;  %356 = vst.msk [vmem:[#allocation2 + $0x2d8] sm:$0xff] %vm264_vm2, %v3853_v6  ;;  %3686 = vmatprep.mubr.msk.bf16.mxu1 %vm984_vm3, %v3783_v28 }
  0x36   : > { %357 = vst.msk [vmem:[#allocation2 + $0x2e0] sm:$0xff] %vm264_vm2, %v3853_v6  ;;  %358 = vst.msk [vmem:[#allocation2 + $0x2e8] sm:$0xff] %vm264_vm2, %v3853_v6 }
  0x37   : > { %359 = vst.msk [vmem:[#allocation2 + $0x2f0] sm:$0xff] %vm264_vm2, %v3853_v6  ;;  %360 = vst.msk [vmem:[#allocation2 + $0x2f8] sm:$0xff] %vm264_vm2, %v3853_v6 }
  0x38   : > { %361 = vst.msk [vmem:[#allocation2 + $0x300] sm:$0xff] %vm264_vm2, %v3853_v6  ;;  %362 = vst.msk [vmem:[#allocation2 + $0x308] sm:$0xff] %vm264_vm2, %v3853_v6 }
  0x39   : > { %363 = vst.msk [vmem:[#allocation2 + $0x310] sm:$0xff] %vm264_vm2, %v3853_v6  ;;  %364 = vst.msk [vmem:[#allocation2 + $0x318] sm:$0xff] %vm264_vm2, %v3853_v6 }
  0x3a   : > { %365 = vst.msk [vmem:[#allocation2 + $0x320] sm:$0xff] %vm264_vm2, %v3853_v6  ;;  %366 = vst.msk [vmem:[#allocation2 + $0x328] sm:$0xff] %vm264_vm2, %v3853_v6 }
  0x3b   : > { %367 = vst.msk [vmem:[#allocation2 + $0x330] sm:$0xff] %vm264_vm2, %v3853_v6  ;;  %368 = vst.msk [vmem:[#allocation2 + $0x338] sm:$0xff] %vm264_vm2, %v3853_v6  ;;  %3623 = vmatmul.mubr.msk.bf16.gmra.mrb[20].mxu0 %vm984_vm3, %v3784_v29 }
  0x3c   : > { %369 = vst.msk [vmem:[#allocation2 + $0x340] sm:$0xff] %vm264_vm2, %v3853_v6  ;;  %370 = vst.msk [vmem:[#allocation2 + $0x348] sm:$0xff] %vm264_vm2, %v3853_v6  ;;  %3687 = vmatmul.mubr.msk.bf16.gmra.mrb[20].mxu1 %vm984_vm3, %v3785_v30  ;;  %3626 = vmatprep.mubr.msk.bf16.mxu0 %vm984_vm3, %v3786_v31  ;;  %v399_v31 = vld [vmem:[#allocation2 + $0x30] sm:$0xff] }
  0x3d   : > { %371 = vst.msk [vmem:[#allocation2 + $0x350] sm:$0xff] %vm264_vm2, %v3853_v6  ;;  %372 = vst.msk [vmem:[#allocation2 + $0x358] sm:$0xff] %vm264_vm2, %v3853_v6  ;;  %3690 = vmatprep.mubr.msk.bf16.mxu1 %vm984_vm3, %v3787_v32  ;;  %v463_v32 = vld [vmem:[#allocation2 + $0x230] sm:$0xff] }
  0x3e   : > { %373 = vst.msk [vmem:[#allocation2 + $0x360] sm:$0xff] %vm264_vm2, %v3853_v6  ;;  %374 = vst.msk [vmem:[#allocation2 + $0x368] sm:$0xff] %vm264_vm2, %v3853_v6 }
  0x3f   : > { %375 = vst.msk [vmem:[#allocation2 + $0x370] sm:$0xff] %vm264_vm2, %v3853_v6  ;;  %376 = vst.msk [vmem:[#allocation2 + $0x378] sm:$0xff] %vm264_vm2, %v3853_v6 }
  0x40   : > { %377 = vst.msk [vmem:[#allocation2 + $0x380] sm:$0xff] %vm264_vm2, %v3853_v6  ;;  %378 = vst.msk [vmem:[#allocation2 + $0x388] sm:$0xff] %vm264_vm2, %v3853_v6 }
  0x41   : > { %379 = vst.msk [vmem:[#allocation2 + $0x390] sm:$0xff] %vm264_vm2, %v3853_v6  ;;  %380 = vst.msk [vmem:[#allocation2 + $0x398] sm:$0xff] %vm264_vm2, %v3853_v6 }
  0x42   : > { %381 = vst.msk [vmem:[#allocation2 + $0x3a0] sm:$0xff] %vm264_vm2, %v3853_v6  ;;  %382 = vst.msk [vmem:[#allocation2 + $0x3a8] sm:$0xff] %vm264_vm2, %v3853_v6 }
  0x43   : > { %383 = vst.msk [vmem:[#allocation2 + $0x3b0] sm:$0xff] %vm264_vm2, %v3853_v6  ;;  %384 = vst.msk [vmem:[#allocation2 + $0x3b8] sm:$0xff] %vm264_vm2, %v3853_v6  ;;  %3627 = vmatmul.mubr.msk.bf16.gmra.mrb[24].mxu0 %vm984_vm3, %v3788_v33  ;;  %v397_v33 = vld [vmem:[#allocation2 + $0x20] sm:$0xff] }
  0x44   : > { %385 = vst.msk [vmem:[#allocation2 + $0x3c0] sm:$0xff] %vm264_vm2, %v3853_v6  ;;  %386 = vst.msk [vmem:[#allocation2 + $0x3c8] sm:$0xff] %vm264_vm2, %v3853_v6  ;;  %3691 = vmatmul.mubr.msk.bf16.gmra.mrb[24].mxu1 %vm984_vm3, %v3789_v34  ;;  %3630 = vmatprep.mubr.msk.bf16.mxu0 %vm984_vm3, %v3790_v35  ;;  %v4309_v34 = vld [vmem:[%s4843_s2] ss:$0 sm:$0xff] }
  0x45   : > { %387 = vst.msk [vmem:[#allocation2 + $0x3d0] sm:$0xff] %vm264_vm2, %v3853_v6  ;;  %388 = vst.msk [vmem:[#allocation2 + $0x3d8] sm:$0xff] %vm264_vm2, %v3853_v6  ;;  %3694 = vmatprep.mubr.msk.bf16.mxu1 %vm984_vm3, %v3791_v36  ;;  %v461_v36 = vld [vmem:[#allocation2 + $0x220] sm:$0xff] }
  0x46   : > { %389 = vst.msk [vmem:[#allocation2 + $0x3e0] sm:$0xff] %vm264_vm2, %v3853_v6  ;;  %390 = vst.msk [vmem:[#allocation2 + $0x3e8] sm:$0xff] %vm264_vm2, %v3853_v6 }
  0x47   : > { %391 = vst.msk [vmem:[#allocation2 + $0x3f0] sm:$0xff] %vm264_vm2, %v3853_v6  ;;  %392 = vst.msk [vmem:[#allocation2 + $0x3f8] sm:$0xff] %vm264_vm2, %v3853_v6  ;;  %v3825_v6 = vld [vmem:[%s4168_s24 + $0x1f8] sm:$0xff]  }
  0x4b   : > { %3631 = vmatmul.mubr.msk.bf16.gmra.mrb[28].mxu0 %vm984_vm3, %v3792_v37  ;;  %v400_v37 = vld [vmem:[#allocation2 + $0x38] sm:$0xff] }
  0x4c   : > { %3695 = vmatmul.mubr.msk.bf16.gmra.mrb[28].mxu1 %vm984_vm3, %v3793_v38  ;;  %3634 = vmatprep.mubr.msk.bf16.mxu0 %vm984_vm3, %v3794_v39 }
  0x4d   : > { %3698 = vmatprep.mubr.msk.bf16.mxu1 %vm984_vm3, %v3795_v40 }
  0x53   : > { %3635 = vmatmul.mubr.msk.bf16.gmra.mrb[32].mxu0 %vm984_vm3, %v3796_v41  ;;  %v464_v41 = vld [vmem:[#allocation2 + $0x238] sm:$0xff] }
  0x54   : > { %3699 = vmatmul.mubr.msk.bf16.gmra.mrb[32].mxu1 %vm984_vm3, %v3797_v42  ;;  %3638 = vmatprep.mubr.msk.bf16.mxu0 %vm984_vm3, %v3798_v43  ;;  %v398_v42 = vld [vmem:[#allocation2 + $0x28] sm:$0xff] }
  0x55   : > { %3702 = vmatprep.mubr.msk.bf16.mxu1 %vm984_vm3, %v3799_v44 }
  0x5b   : > { %3639 = vmatmul.mubr.msk.bf16.gmra.mrb[36].mxu0 %vm984_vm3, %v3800_v45 }
  0x5c   : > { %3703 = vmatmul.mubr.msk.bf16.gmra.mrb[36].mxu1 %vm984_vm3, %v3801_v46  ;;  %3642 = vmatprep.mubr.msk.bf16.mxu0 %vm984_vm3, %v3802_v47 }
  0x5d   : > { %3706 = vmatprep.mubr.msk.bf16.mxu1 %vm984_vm3, %v3803_v48  ;;  %v462_v48 = vld [vmem:[#allocation2 + $0x228] sm:$0xff] }
  0x63   : > { %3643 = vmatmul.mubr.msk.bf16.gmra.mrb[40].mxu0 %vm984_vm3, %v3804_v49 }
  0x64   : > { %3707 = vmatmul.mubr.msk.bf16.gmra.mrb[40].mxu1 %vm984_vm3, %v3805_v50  ;;  %3646 = vmatprep.mubr.msk.bf16.mxu0 %vm984_vm3, %v3806_v51 }
  0x65   : > { %3710 = vmatprep.mubr.msk.bf16.mxu1 %vm984_vm3, %v3807_v52 }
  0x6b   : > { %3647 = vmatmul.mubr.msk.bf16.gmra.mrb[44].mxu0 %vm984_vm3, %v3808_v53 }
  0x6c   : > { %3711 = vmatmul.mubr.msk.bf16.gmra.mrb[44].mxu1 %vm984_vm3, %v3809_v54  ;;  %3650 = vmatprep.mubr.msk.bf16.mxu0 %vm984_vm3, %v3810_v55 }
  0x6d   : > { %3714 = vmatprep.mubr.msk.bf16.mxu1 %vm984_vm3, %v3811_v56 }
  0x73   : > { %3651 = vmatmul.mubr.msk.bf16.gmra.mrb[48].mxu0 %vm984_vm3, %v3812_v57 }
  0x74   : > { %3715 = vmatmul.mubr.msk.bf16.gmra.mrb[48].mxu1 %vm984_vm3, %v3813_v58  ;;  %3654 = vmatprep.mubr.msk.bf16.mxu0 %vm984_vm3, %v3814_v59 }
  0x75   : > { %3718 = vmatprep.mubr.msk.bf16.mxu1 %vm984_vm3, %v3815_v60 }
  0x7b   : > { %3655 = vmatmul.mubr.msk.bf16.gmra.mrb[52].mxu0 %vm984_vm3, %v3816_v61 }
  0x7c   : > { %3719 = vmatmul.mubr.msk.bf16.gmra.mrb[52].mxu1 %vm984_vm3, %v3817_v62  ;;  %3658 = vmatprep.mubr.msk.bf16.mxu0 %vm984_vm3, %v3818_v63 }
  0x7d   : > { %3722 = vmatprep.mubr.msk.bf16.mxu1 %vm984_vm3, %v3819_v0 }
  0x83   : > { %3659 = vmatmul.mubr.msk.bf16.gmra.mrb[56].mxu0 %vm984_vm3, %v3820_v1 }
  0x84   : > { %3723 = vmatmul.mubr.msk.bf16.gmra.mrb[56].mxu1 %vm984_vm3, %v3821_v2  ;;  %3662 = vmatprep.mubr.msk.bf16.mxu0 %vm984_vm3, %v3822_v3 }
  0x85   : > { %3726 = vmatprep.mubr.msk.bf16.mxu1 %vm984_vm3, %v3823_v4 }
  0x8b   : > { %3663 = vmatmul.mubr.msk.bf16.gmra.mrb[60].mxu0 %vm984_vm3, %v3824_v5 }
  0x8c   : > { %3727 = vmatmul.mubr.msk.bf16.gmra.mrb[60].mxu1 %vm984_vm3, %v3825_v6 }
  0xe6   : > { %v3604_v10 = vpop.f32.mrb[0].mxu0 }
  0xe7   : > { %v1731_v13 = vadd.f32 %v3604_v10, %v395_v7  ;;  %v3668_v14 = vpop.f32.mrb[0].mxu1  ;;  %v1218_v15 = vpop.f32.mrb[1].mxu0  ;;  %v403_v10 = vld [vmem:[#allocation2 + $0x50] sm:$0xff] }
  0xe8   : > { %v1795_v18 = vadd.f32 %v3668_v14, %v459_v8  ;;  %v1729_v19 = vadd.f32 %v1218_v15, %v393_v9  ;;  %v1474_v20 = vpop.f32.mrb[1].mxu1  ;;  %v3605_v21 = vpop.f32.mrb[2].mxu0  ;;  %v467_v15 = vld [vmem:[#allocation2 + $0x250] sm:$0xff] }
  0xe9   : > { %1860 = vst.msk [vmem:[#allocation2 + $0x10] sm:$0xff] %vm264_vm2, %v1731_v13  ;;  %v1793_v23 = vadd.f32 %v1474_v20, %v457_v11  ;;  %v1732_v24 = vadd.f32 %v3605_v21, %v396_v12  ;;  %v3669_v25 = vpop.f32.mrb[2].mxu1  ;;  %v1221_v26 = vpop.f32.mrb[3].mxu0 }
  0xea   : > { %1924 = vst.msk [vmem:[#allocation2 + $0x210] sm:$0xff] %vm264_vm2, %v1795_v18  ;;  %1858 = vst.msk [vmem:[#allocation2] sm:$0xff] %vm264_vm2, %v1729_v19  ;;  %v1796_v27 = vadd.f32 %v3669_v25, %v460_v16  ;;  %v1730_v28 = vadd.f32 %v1221_v26, %v394_v17  ;;  %v1477_v29 = vpop.f32.mrb[3].mxu1  ;;  %v401_v16 = vld [vmem:[#allocation2 + $0x40] sm:$0xff] }
  0xeb   : > { %1922 = vst.msk [vmem:[#allocation2 + $0x200] sm:$0xff] %vm264_vm2, %v1793_v23  ;;  %1861 = vst.msk [vmem:[#allocation2 + $0x18] sm:$0xff] %vm264_vm2, %v1732_v24  ;;  %v1794_v30 = vadd.f32 %v1477_v29, %v458_v22  ;;  %v465_v22 = vld [vmem:[#allocation2 + $0x240] sm:$0xff]  ;;  %v404_v23 = vld [vmem:[#allocation2 + $0x58] sm:$0xff] }
  0xec   : > { %1925 = vst.msk [vmem:[#allocation2 + $0x218] sm:$0xff] %vm264_vm2, %v1796_v27  ;;  %1859 = vst.msk [vmem:[#allocation2 + $0x8] sm:$0xff] %vm264_vm2, %v1730_v28 }
  0xed   : > { %1923 = vst.msk [vmem:[#allocation2 + $0x208] sm:$0xff] %vm264_vm2, %v1794_v30  ;;  %v468_v30 = vld [vmem:[#allocation2 + $0x258] sm:$0xff] }
  0xee   : > { %v3608_v35 = vpop.f32.mrb[4].mxu0 }
  0xef   : > { %v1735_v38 = vadd.f32 %v3608_v35, %v399_v31  ;;  %v3672_v39 = vpop.f32.mrb[4].mxu1  ;;  %v1234_v40 = vpop.f32.mrb[5].mxu0  ;;  %v402_v31 = vld [vmem:[#allocation2 + $0x48] sm:$0xff] }
  0xf0   : > { %v1991_v43 = vld [vmem:[#allocation2 + $0x10] sm:$0xff]  ;;  %v1799_v44 = vadd.f32 %v3672_v39, %v463_v32  ;;  %v1733_v45 = vadd.f32 %v1234_v40, %v397_v33  ;;  %v1490_v46 = vpop.f32.mrb[5].mxu1  ;;  %v3609_v47 = vpop.f32.mrb[6].mxu0  ;;  %v466_v40 = vld [vmem:[#allocation2 + $0x248] sm:$0xff] }
  0xf1   : > { %v2126_v49 = vadd.f32 %v4309_v34, %v1991_v43  ;;  %v2055_v50 = vld [vmem:[#allocation2 + $0x210] sm:$0xff]  ;;  %v1989_v51 = vld [vmem:[#allocation2] sm:$0xff]  ;;  %1864 = vst.msk [vmem:[#allocation2 + $0x30] sm:$0xff] %vm264_vm2, %v1735_v38  ;;  %v1797_v52 = vadd.f32 %v1490_v46, %v461_v36  ;;  %v1736_v53 = vadd.f32 %v3609_v47, %v400_v37  ;;  %v3673_v54 = vpop.f32.mrb[6].mxu1  ;;  %v1237_v55 = vpop.f32.mrb[7].mxu0 }
  0xf2   : > { %v2190_v56 = vadd.f32 %v4309_v34, %v2055_v50  ;;  %v2124_v57 = vadd.f32 %v4309_v34, %v1989_v51  ;;  %v2053_v58 = vld [vmem:[#allocation2 + $0x200] sm:$0xff]  ;;  %v1992_v59 = vld [vmem:[#allocation2 + $0x18] sm:$0xff]  ;;  %1928 = vst.msk [vmem:[#allocation2 + $0x230] sm:$0xff] %vm264_vm2, %v1799_v44  ;;  %1862 = vst.msk [vmem:[#allocation2 + $0x20] sm:$0xff] %vm264_vm2, %v1733_v45  ;;  %v1800_v60 = vadd.f32 %v3673_v54, %v464_v41  ;;  %v1493_v62 = vpop.f32.mrb[7].mxu1 }
  0xf3   : > { %v1734_v61 = vadd.f32 %v1237_v55, %v398_v42  ;;  %v2254_v63 = vmax.f32 %v2126_v49, 0.0  ;;  %v2188_v0 = vadd.f32 %v4309_v34, %v2053_v58  ;;  %v2127_v1 = vadd.f32 %v4309_v34, %v1992_v59  ;;  %v2056_v2 = vld [vmem:[#allocation2 + $0x218] sm:$0xff]  ;;  %v1990_v3 = vld [vmem:[#allocation2 + $0x8] sm:$0xff]  ;;  %1926 = vst.msk [vmem:[#allocation2 + $0x220] sm:$0xff] %vm264_vm2, %v1797_v52  ;;  %1865 = vst.msk [vmem:[#allocation2 + $0x38] sm:$0xff] %vm264_vm2, %v1736_v53 }
  0xf4   : > { %v1798_v4 = vadd.f32 %v1493_v62, %v462_v48  ;;  %v2318_v5 = vmax.f32 %v2190_v56, 0.0  ;;  %v2252_v6 = vmax.f32 %v2124_v57, 0.0  ;;  %v2191_v7 = vadd.f32 %v4309_v34, %v2056_v2  ;;  %v2054_v9 = vld [vmem:[#allocation2 + $0x208] sm:$0xff]  ;;  %1929 = vst.msk [vmem:[#allocation2 + $0x238] sm:$0xff] %vm264_vm2, %v1800_v60 }
  0xf5   : > { %v2125_v8 = vadd.f32 %v4309_v34, %v1990_v3  ;;  %1863 = vst.msk [vmem:[#allocation2 + $0x28] sm:$0xff] %vm264_vm2, %v1734_v61  ;;  %v3406_v11 = vpack.c.bf16 %v2254_v63, %v2254_v63  ;;  %v2316_v12 = vmax.f32 %v2188_v0, 0.0  ;;  %v2255_v13 = vmax.f32 %v2127_v1, 0.0  ;;  %v407_v3 = vld [vmem:[#allocation2 + $0x70] sm:$0xff] }
  0xf6   : > { %v2189_v14 = vadd.f32 %v4309_v34, %v2054_v9  ;;  %1927 = vst.msk [vmem:[#allocation2 + $0x228] sm:$0xff] %vm264_vm2, %v1798_v4  ;;  %v3470_v17 = vpack.c.bf16 %v2318_v5, %v2318_v5  ;;  %v3404_v18 = vpack.c.bf16 %v2252_v6, %v2252_v6  ;;  %v2319_v19 = vmax.f32 %v2191_v7, 0.0  ;;  %v3612_v21 = vpop.f32.mrb[8].mxu0  ;;  %v405_v9 = vld [vmem:[#allocation2 + $0x60] sm:$0xff] }
  0xf7   : > { %v2253_v20 = vmax.f32 %v2125_v8, 0.0  ;;  %2895 = vst.msk [vmem:[%s4326_s29 + $0x8] sm:$0xf] %vm2892_vm4, %v3406_v11  ;;  %v3468_v24 = vpack.c.bf16 %v2316_v12, %v2316_v12  ;;  %v3407_v25 = vpack.c.bf16 %v2255_v13, %v2255_v13  ;;  %v1739_v27 = vadd.f32 %v3612_v21, %v403_v10  ;;  %v3676_v28 = vpop.f32.mrb[8].mxu1  ;;  %v1250_v29 = vpop.f32.mrb[9].mxu0  ;;  %v471_v8 = vld [vmem:[#allocation2 + $0x270] sm:$0xff] }
  0xf8   : > { %v2317_v26 = vmax.f32 %v2189_v14, 0.0  ;;  %2959 = vst.msk [vmem:[%s4326_s29 + $0x108] sm:$0xf] %vm2892_vm4, %v3470_v17  ;;  %2893 = vst.msk [vmem:[%s4326_s29] sm:$0xf] %vm2892_vm4, %v3404_v18  ;;  %v3471_v32 = vpack.c.bf16 %v2319_v19, %v2319_v19  ;;  %v1995_v35 = vld [vmem:[#allocation2 + $0x30] sm:$0xff]  ;;  %v1803_v36 = vadd.f32 %v3676_v28, %v467_v15  ;;  %v1737_v37 = vadd.f32 %v1250_v29, %v401_v16 }
  0xf9   : > { %v3405_v33 = vpack.c.bf16 %v2253_v20, %v2253_v20  ;;  %v1506_v38 = vpop.f32.mrb[9].mxu1  ;;  %v3613_v39 = vpop.f32.mrb[10].mxu0  ;;  %2957 = vst.msk [vmem:[%s4326_s29 + $0x100] sm:$0xf] %vm2892_vm4, %v3468_v24  ;;  %2896 = vst.msk [vmem:[%s4326_s29 + $0xc] sm:$0xf] %vm2892_vm4, %v3407_v25  ;;  %v2130_v42 = vadd.f32 %v4309_v34, %v1995_v35 }
  0xfa   : > { %v3469_v41 = vpack.c.bf16 %v2317_v26, %v2317_v26  ;;  %v2059_v43 = vld [vmem:[#allocation2 + $0x230] sm:$0xff]  ;;  %v1993_v44 = vld [vmem:[#allocation2 + $0x20] sm:$0xff]  ;;  %1868 = vst.msk [vmem:[#allocation2 + $0x50] sm:$0xff] %vm264_vm2, %v1739_v27  ;;  %v1801_v45 = vadd.f32 %v1506_v38, %v465_v22  ;;  %v1740_v46 = vadd.f32 %v3613_v39, %v404_v23  ;;  %v3677_v47 = vpop.f32.mrb[10].mxu1  ;;  %v1253_v48 = vpop.f32.mrb[11].mxu0  ;;  %v1996_v52 = vld [vmem:[#allocation2 + $0x38] sm:$0xff] }
  0xfb   : > { %2960 = vst.msk [vmem:[%s4326_s29 + $0x10c] sm:$0xf] %vm2892_vm4, %v3471_v32  ;;  %2894 = vst.msk [vmem:[%s4326_s29 + $0x4] sm:$0xf] %vm2892_vm4, %v3405_v33  ;;  %v2194_v49 = vadd.f32 %v4309_v34, %v2059_v43  ;;  %v2128_v50 = vadd.f32 %v4309_v34, %v1993_v44  ;;  %v2057_v51 = vld [vmem:[#allocation2 + $0x220] sm:$0xff]  ;;  %v1804_v53 = vadd.f32 %v3677_v47, %v468_v30  ;;  %v1509_v55 = vpop.f32.mrb[11].mxu1 }
  0xfc   : > { %1932 = vst.msk [vmem:[#allocation2 + $0x250] sm:$0xff] %vm264_vm2, %v1803_v36  ;;  %1866 = vst.msk [vmem:[#allocation2 + $0x40] sm:$0xff] %vm264_vm2, %v1737_v37  ;;  %v1738_v54 = vadd.f32 %v1253_v48, %v402_v31  ;;  %v2258_v56 = vmax.f32 %v2130_v42, 0.0  ;;  %v2192_v57 = vadd.f32 %v4309_v34, %v2057_v51  ;;  %v2131_v58 = vadd.f32 %v4309_v34, %v1996_v52  ;;  %v2060_v59 = vld [vmem:[#allocation2 + $0x238] sm:$0xff]  ;;  %v1994_v60 = vld [vmem:[#allocation2 + $0x28] sm:$0xff] }
  0xfd   : > { %2958 = vst.msk [vmem:[%s4326_s29 + $0x104] sm:$0xf] %vm2892_vm4, %v3469_v41  ;;  %v1802_v61 = vadd.f32 %v1509_v55, %v466_v40  ;;  %v2322_v62 = vmax.f32 %v2194_v49, 0.0  ;;  %v2256_v63 = vmax.f32 %v2128_v50, 0.0  ;;  %v2195_v0 = vadd.f32 %v4309_v34, %v2060_v59  ;;  %v2058_v2 = vld [vmem:[#allocation2 + $0x228] sm:$0xff]  ;;  %v469_v15 = vld [vmem:[#allocation2 + $0x260] sm:$0xff] }
  0xfe   : > { %1930 = vst.msk [vmem:[#allocation2 + $0x240] sm:$0xff] %vm264_vm2, %v1801_v45  ;;  %1869 = vst.msk [vmem:[#allocation2 + $0x58] sm:$0xff] %vm264_vm2, %v1740_v46  ;;  %v2129_v1 = vadd.f32 %v4309_v34, %v1994_v60  ;;  %v3410_v4 = vpack.c.bf16 %v2258_v56, %v2258_v56  ;;  %v2320_v5 = vmax.f32 %v2192_v57, 0.0  ;;  %v2259_v6 = vmax.f32 %v2131_v58, 0.0  ;;  %v3616_v14 = vpop.f32.mrb[12].mxu0  ;;  %v408_v16 = vld [vmem:[#allocation2 + $0x78] sm:$0xff] }
  0xff   : > { %1933 = vst.msk [vmem:[#allocation2 + $0x258] sm:$0xff] %vm264_vm2, %v1804_v53  ;;  %1867 = vst.msk [vmem:[#allocation2 + $0x48] sm:$0xff] %vm264_vm2, %v1738_v54  ;;  %v2193_v7 = vadd.f32 %v4309_v34, %v2058_v2  ;;  %v3474_v10 = vpack.c.bf16 %v2322_v62, %v2322_v62  ;;  %v3408_v11 = vpack.c.bf16 %v2256_v63, %v2256_v63  ;;  %v2323_v12 = vmax.f32 %v2195_v0, 0.0  ;;  %v3680_v21 = vpop.f32.mrb[12].mxu1  ;;  %v1266_v22 = vpop.f32.mrb[13].mxu0  ;;  %v472_v23 = vld [vmem:[#allocation2 + $0x278] sm:$0xff] }
 0x100   : > { %1931 = vst.msk [vmem:[#allocation2 + $0x248] sm:$0xff] %vm264_vm2, %v1802_v61  ;;  %v2257_v13 = vmax.f32 %v2129_v1, 0.0  ;;  %v3472_v17 = vpack.c.bf16 %v2320_v5, %v2320_v5  ;;  %v3411_v18 = vpack.c.bf16 %v2259_v6, %v2259_v6  ;;  %v1743_v20 = vadd.f32 %v3616_v14, %v407_v3  ;;  %v406_v24 = vld [vmem:[#allocation2 + $0x68] sm:$0xff]  ;;  %v1522_v30 = vpop.f32.mrb[13].mxu1  ;;  %v3617_v31 = vpop.f32.mrb[14].mxu0  ;;  %v411_v60 = vld [vmem:[#allocation2 + $0x90] sm:$0xff] }
 0x101   : > { %2899 = vst.msk [vmem:[%s4326_s29 + $0x18] sm:$0xf] %vm2892_vm4, %v3410_v4  ;;  %v2321_v19 = vmax.f32 %v2193_v7, 0.0  ;;  %2963 = vst.msk [vmem:[%s4326_s29 + $0x118] sm:$0xf] %vm2892_vm4, %v3474_v10  ;;  %v3475_v25 = vpack.c.bf16 %v2323_v12, %v2323_v12  ;;  %v1999_v27 = vld [vmem:[#allocation2 + $0x50] sm:$0xff]  ;;  %v1807_v28 = vadd.f32 %v3680_v21, %v471_v8  ;;  %v1741_v29 = vadd.f32 %v1266_v22, %v405_v9 }
 0x102   : > { %2897 = vst.msk [vmem:[%s4326_s29 + $0x10] sm:$0xf] %vm2892_vm4, %v3408_v11  ;;  %v3409_v26 = vpack.c.bf16 %v2257_v13, %v2257_v13  ;;  %v470_v32 = vld [vmem:[#allocation2 + $0x268] sm:$0xff]  ;;  %2961 = vst.msk [vmem:[%s4326_s29 + $0x110] sm:$0xf] %vm2892_vm4, %v3472_v17  ;;  %v2134_v35 = vadd.f32 %v4309_v34, %v1999_v27  ;;  %v1805_v38 = vadd.f32 %v1522_v30, %v469_v15  ;;  %v3681_v40 = vpop.f32.mrb[14].mxu1 }
 0x103   : > { %2900 = vst.msk [vmem:[%s4326_s29 + $0x1c] sm:$0xf] %vm2892_vm4, %v3411_v18  ;;  %v3473_v33 = vpack.c.bf16 %v2321_v19, %v2321_v19  ;;  %v2063_v36 = vld [vmem:[#allocation2 + $0x250] sm:$0xff]  ;;  %v1997_v37 = vld [vmem:[#allocation2 + $0x40] sm:$0xff]  ;;  %v1744_v39 = vadd.f32 %v3617_v31, %v408_v16  ;;  %v1269_v41 = vpop.f32.mrb[15].mxu0  ;;  %v1808_v46 = vadd.f32 %v3681_v40, %v472_v23  ;;  %v1525_v48 = vpop.f32.mrb[15].mxu1 }
 0x104   : > { %1872 = vst.msk [vmem:[#allocation2 + $0x70] sm:$0xff] %vm264_vm2, %v1743_v20  ;;  %v2198_v42 = vadd.f32 %v4309_v34, %v2063_v36  ;;  %v2132_v43 = vadd.f32 %v4309_v34, %v1997_v37  ;;  %1936 = vst.msk [vmem:[#allocation2 + $0x270] sm:$0xff] %vm264_vm2, %v1807_v28  ;;  %v1742_v47 = vadd.f32 %v1269_v41, %v406_v24  ;;  %v2262_v49 = vmax.f32 %v2134_v35, 0.0  ;;  %v475_v1 = vld [vmem:[#allocation2 + $0x290] sm:$0xff]  ;;  %v409_v2 = vld [vmem:[#allocation2 + $0x80] sm:$0xff] }
 0x105   : > { %2964 = vst.msk [vmem:[%s4326_s29 + $0x11c] sm:$0xf] %vm2892_vm4, %v3475_v25  ;;  %2898 = vst.msk [vmem:[%s4326_s29 + $0x14] sm:$0xf] %vm2892_vm4, %v3409_v26  ;;  %v2061_v44 = vld [vmem:[#allocation2 + $0x240] sm:$0xff]  ;;  %v2000_v45 = vld [vmem:[#allocation2 + $0x58] sm:$0xff]  ;;  %v1806_v54 = vadd.f32 %v1525_v48, %v470_v32 }
 0x106   : > { %1870 = vst.msk [vmem:[#allocation2 + $0x60] sm:$0xff] %vm264_vm2, %v1741_v29  ;;  %v2196_v50 = vadd.f32 %v4309_v34, %v2061_v44  ;;  %v2135_v51 = vadd.f32 %v4309_v34, %v2000_v45  ;;  %v2064_v52 = vld [vmem:[#allocation2 + $0x258] sm:$0xff]  ;;  %v1998_v53 = vld [vmem:[#allocation2 + $0x48] sm:$0xff]  ;;  %1934 = vst.msk [vmem:[#allocation2 + $0x260] sm:$0xff] %vm264_vm2, %v1805_v38  ;;  %v2326_v55 = vmax.f32 %v2198_v42, 0.0  ;;  %v2260_v56 = vmax.f32 %v2132_v43, 0.0 }
 0x107   : > { %2962 = vst.msk [vmem:[%s4326_s29 + $0x114] sm:$0xf] %vm2892_vm4, %v3473_v33  ;;  %v2199_v57 = vadd.f32 %v4309_v34, %v2064_v52  ;;  %v2133_v58 = vadd.f32 %v4309_v34, %v1998_v53  ;;  %v2062_v59 = vld [vmem:[#allocation2 + $0x248] sm:$0xff]  ;;  %v3414_v61 = vpack.c.bf16 %v2262_v49, %v2262_v49  ;;  %v3620_v7 = vpop.f32.mrb[16].mxu0  ;;  %v473_v8 = vld [vmem:[#allocation2 + $0x280] sm:$0xff]  ;;  %v412_v9 = vld [vmem:[#allocation2 + $0x98] sm:$0xff] }
 0x108   : > { %1873 = vst.msk [vmem:[#allocation2 + $0x78] sm:$0xff] %vm264_vm2, %v1744_v39  ;;  %1937 = vst.msk [vmem:[#allocation2 + $0x278] sm:$0xff] %vm264_vm2, %v1808_v46  ;;  %v2324_v62 = vmax.f32 %v2196_v50, 0.0  ;;  %v2263_v63 = vmax.f32 %v2135_v51, 0.0  ;;  %v2197_v0 = vadd.f32 %v4309_v34, %v2062_v59  ;;  %v3478_v3 = vpack.c.bf16 %v2326_v55, %v2326_v55  ;;  %v3684_v14 = vpop.f32.mrb[16].mxu1  ;;  %v1282_v15 = vpop.f32.mrb[17].mxu0 }
 0x109   : > { %1871 = vst.msk [vmem:[#allocation2 + $0x68] sm:$0xff] %vm264_vm2, %v1742_v47  ;;  %1935 = vst.msk [vmem:[#allocation2 + $0x268] sm:$0xff] %vm264_vm2, %v1806_v54  ;;  %v3412_v4 = vpack.c.bf16 %v2260_v56, %v2260_v56  ;;  %v2327_v5 = vmax.f32 %v2199_v57, 0.0  ;;  %v2261_v6 = vmax.f32 %v2133_v58, 0.0  ;;  %v1747_v13 = vadd.f32 %v3620_v7, %v411_v60  ;;  %v476_v16 = vld [vmem:[#allocation2 + $0x298] sm:$0xff]  ;;  %v410_v17 = vld [vmem:[#allocation2 + $0x88] sm:$0xff] }
 0x10a   : > { %2903 = vst.msk [vmem:[%s4326_s29 + $0x28] sm:$0xf] %vm2892_vm4, %v3414_v61  ;;  %v3476_v10 = vpack.c.bf16 %v2324_v62, %v2324_v62  ;;  %v3415_v11 = vpack.c.bf16 %v2263_v63, %v2263_v63  ;;  %v2325_v12 = vmax.f32 %v2197_v0, 0.0  ;;  %2967 = vst.msk [vmem:[%s4326_s29 + $0x128] sm:$0xf] %vm2892_vm4, %v3478_v3  ;;  %v1811_v21 = vadd.f32 %v3684_v14, %v475_v1  ;;  %v1538_v23 = vpop.f32.mrb[17].mxu1 }
 0x10b   : > { %2901 = vst.msk [vmem:[%s4326_s29 + $0x20] sm:$0xf] %vm2892_vm4, %v3412_v4  ;;  %v3479_v18 = vpack.c.bf16 %v2327_v5, %v2327_v5  ;;  %v3413_v19 = vpack.c.bf16 %v2261_v6, %v2261_v6  ;;  %v2003_v20 = vld [vmem:[#allocation2 + $0x70] sm:$0xff]  ;;  %v1745_v22 = vadd.f32 %v1282_v15, %v409_v2  ;;  %v3621_v24 = vpop.f32.mrb[18].mxu0  ;;  %v474_v25 = vld [vmem:[#allocation2 + $0x288] sm:$0xff]  ;;  %v1809_v30 = vadd.f32 %v1538_v23, %v473_v8  ;;  %v3685_v32 = vpop.f32.mrb[18].mxu1 }
 0x10c   : > { %2965 = vst.msk [vmem:[%s4326_s29 + $0x120] sm:$0xf] %vm2892_vm4, %v3476_v10  ;;  %2904 = vst.msk [vmem:[%s4326_s29 + $0x2c] sm:$0xf] %vm2892_vm4, %v3415_v11  ;;  %v3477_v26 = vpack.c.bf16 %v2325_v12, %v2325_v12  ;;  %v2138_v27 = vadd.f32 %v4309_v34, %v2003_v20  ;;  %v2067_v28 = vld [vmem:[#allocation2 + $0x270] sm:$0xff]  ;;  %v1748_v31 = vadd.f32 %v3621_v24, %v412_v9  ;;  %v1285_v33 = vpop.f32.mrb[19].mxu0 }
 0x10d   : > { %v2001_v29 = vld [vmem:[#allocation2 + $0x60] sm:$0xff]  ;;  %1876 = vst.msk [vmem:[#allocation2 + $0x90] sm:$0xff] %vm264_vm2, %v1747_v13  ;;  %v2202_v35 = vadd.f32 %v4309_v34, %v2067_v28  ;;  %1940 = vst.msk [vmem:[#allocation2 + $0x290] sm:$0xff] %vm264_vm2, %v1811_v21  ;;  %v1812_v39 = vadd.f32 %v3685_v32, %v476_v16  ;;  %v1746_v40 = vadd.f32 %v1285_v33, %v410_v17  ;;  %v1541_v41 = vpop.f32.mrb[19].mxu1  ;;  %v415_v53 = vld [vmem:[#allocation2 + $0xb0] sm:$0xff] }
 0x10e   : > { %2968 = vst.msk [vmem:[%s4326_s29 + $0x12c] sm:$0xf] %vm2892_vm4, %v3479_v18  ;;  %2902 = vst.msk [vmem:[%s4326_s29 + $0x24] sm:$0xf] %vm2892_vm4, %v3413_v19  ;;  %v2136_v36 = vadd.f32 %v4309_v34, %v2001_v29  ;;  %v2065_v37 = vld [vmem:[#allocation2 + $0x260] sm:$0xff]  ;;  %v2266_v42 = vmax.f32 %v2138_v27, 0.0  ;;  %v1810_v47 = vadd.f32 %v1541_v41, %v474_v25 }
 0x10f   : > { %v2004_v38 = vld [vmem:[#allocation2 + $0x78] sm:$0xff]  ;;  %1874 = vst.msk [vmem:[#allocation2 + $0x80] sm:$0xff] %vm264_vm2, %v1745_v22  ;;  %v2200_v43 = vadd.f32 %v4309_v34, %v2065_v37  ;;  %1938 = vst.msk [vmem:[#allocation2 + $0x280] sm:$0xff] %vm264_vm2, %v1809_v30  ;;  %v2330_v48 = vmax.f32 %v2202_v35, 0.0  ;;  %v479_v58 = vld [vmem:[#allocation2 + $0x2b0] sm:$0xff]  ;;  %v3624_v0 = vpop.f32.mrb[20].mxu0 }
 0x110   : > { %2966 = vst.msk [vmem:[%s4326_s29 + $0x124] sm:$0xf] %vm2892_vm4, %v3477_v26  ;;  %v2139_v44 = vadd.f32 %v4309_v34, %v2004_v38  ;;  %v2068_v45 = vld [vmem:[#allocation2 + $0x278] sm:$0xff]  ;;  %v2002_v46 = vld [vmem:[#allocation2 + $0x68] sm:$0xff]  ;;  %v2264_v49 = vmax.f32 %v2136_v36, 0.0  ;;  %v3418_v54 = vpack.c.bf16 %v2266_v42, %v2266_v42  ;;  %v413_v59 = vld [vmem:[#allocation2 + $0xa0] sm:$0xff]  ;;  %v1751_v6 = vadd.f32 %v3624_v0, %v415_v53 }
 0x111   : > { %1877 = vst.msk [vmem:[#allocation2 + $0x98] sm:$0xff] %vm264_vm2, %v1748_v31  ;;  %v2203_v50 = vadd.f32 %v4309_v34, %v2068_v45  ;;  %v2137_v51 = vadd.f32 %v4309_v34, %v2002_v46  ;;  %v2066_v52 = vld [vmem:[#allocation2 + $0x268] sm:$0xff]  ;;  %1941 = vst.msk [vmem:[#allocation2 + $0x298] sm:$0xff] %vm264_vm2, %v1812_v39  ;;  %v2328_v55 = vmax.f32 %v2200_v43, 0.0  ;;  %v3482_v60 = vpack.c.bf16 %v2330_v48, %v2330_v48  ;;  %v477_v1 = vld [vmem:[#allocation2 + $0x2a0] sm:$0xff]  ;;  %v3688_v7 = vpop.f32.mrb[20].mxu1 }
 0x112   : > { %1875 = vst.msk [vmem:[#allocation2 + $0x88] sm:$0xff] %vm264_vm2, %v1746_v40  ;;  %v2267_v56 = vmax.f32 %v2139_v44, 0.0  ;;  %v2201_v57 = vadd.f32 %v4309_v34, %v2066_v52  ;;  %1939 = vst.msk [vmem:[#allocation2 + $0x288] sm:$0xff] %vm264_vm2, %v1810_v47  ;;  %v3416_v61 = vpack.c.bf16 %v2264_v49, %v2264_v49  ;;  %v416_v2 = vld [vmem:[#allocation2 + $0xb8] sm:$0xff]  ;;  %v1298_v8 = vpop.f32.mrb[21].mxu0  ;;  %v414_v10 = vld [vmem:[#allocation2 + $0xa8] sm:$0xff]  ;;  %v1815_v14 = vadd.f32 %v3688_v7, %v479_v58 }
 0x113   : > { %v2331_v62 = vmax.f32 %v2203_v50, 0.0  ;;  %v2265_v63 = vmax.f32 %v2137_v51, 0.0  ;;  %2907 = vst.msk [vmem:[%s4326_s29 + $0x38] sm:$0xf] %vm2892_vm4, %v3418_v54  ;;  %v3480_v3 = vpack.c.bf16 %v2328_v55, %v2328_v55  ;;  %v480_v9 = vld [vmem:[#allocation2 + $0x2b8] sm:$0xff]  ;;  %v1749_v15 = vadd.f32 %v1298_v8, %v413_v59  ;;  %v1554_v16 = vpop.f32.mrb[21].mxu1 }
 0x114   : > { %v3419_v4 = vpack.c.bf16 %v2267_v56, %v2267_v56  ;;  %v2329_v5 = vmax.f32 %v2201_v57, 0.0  ;;  %2971 = vst.msk [vmem:[%s4326_s29 + $0x138] sm:$0xf] %vm2892_vm4, %v3482_v60  ;;  %2905 = vst.msk [vmem:[%s4326_s29 + $0x30] sm:$0xf] %vm2892_vm4, %v3416_v61  ;;  %v2007_v13 = vld [vmem:[#allocation2 + $0x90] sm:$0xff]  ;;  %v1813_v23 = vadd.f32 %v1554_v16, %v477_v1 }
 0x115   : > { %v3483_v11 = vpack.c.bf16 %v2331_v62, %v2331_v62  ;;  %v3417_v12 = vpack.c.bf16 %v2265_v63, %v2265_v63  ;;  %v3625_v17 = vpop.f32.mrb[22].mxu0  ;;  %v478_v18 = vld [vmem:[#allocation2 + $0x2a8] sm:$0xff]  ;;  %2969 = vst.msk [vmem:[%s4326_s29 + $0x130] sm:$0xf] %vm2892_vm4, %v3480_v3  ;;  %v2142_v20 = vadd.f32 %v4309_v34, %v2007_v13  ;;  %v2071_v21 = vld [vmem:[#allocation2 + $0x290] sm:$0xff]  ;;  %v3689_v25 = vpop.f32.mrb[22].mxu1 }
 0x116   : > { %2908 = vst.msk [vmem:[%s4326_s29 + $0x3c] sm:$0xf] %vm2892_vm4, %v3419_v4  ;;  %v3481_v19 = vpack.c.bf16 %v2329_v5, %v2329_v5  ;;  %v2005_v22 = vld [vmem:[#allocation2 + $0x80] sm:$0xff]  ;;  %v1752_v24 = vadd.f32 %v3625_v17, %v416_v2  ;;  %v1301_v26 = vpop.f32.mrb[23].mxu0  ;;  %v2206_v27 = vadd.f32 %v4309_v34, %v2071_v21  ;;  %v1816_v31 = vadd.f32 %v3689_v25, %v480_v9  ;;  %v1557_v33 = vpop.f32.mrb[23].mxu1  ;;  %v419_v46 = vld [vmem:[#allocation2 + $0xd0] sm:$0xff] }
 0x117   : > { %1880 = vst.msk [vmem:[#allocation2 + $0xb0] sm:$0xff] %vm264_vm2, %v1751_v6  ;;  %v2140_v28 = vadd.f32 %v4309_v34, %v2005_v22  ;;  %v2069_v29 = vld [vmem:[#allocation2 + $0x280] sm:$0xff]  ;;  %1944 = vst.msk [vmem:[#allocation2 + $0x2b0] sm:$0xff] %vm264_vm2, %v1815_v14  ;;  %v1750_v32 = vadd.f32 %v1301_v26, %v414_v10  ;;  %v2270_v35 = vmax.f32 %v2142_v20, 0.0  ;;  %v1814_v40 = vadd.f32 %v1557_v33, %v478_v18  ;;  %v483_v51 = vld [vmem:[#allocation2 + $0x2d0] sm:$0xff]  ;;  %v3628_v57 = vpop.f32.mrb[24].mxu0 }
 0x118   : > { %2972 = vst.msk [vmem:[%s4326_s29 + $0x13c] sm:$0xf] %vm2892_vm4, %v3483_v11  ;;  %2906 = vst.msk [vmem:[%s4326_s29 + $0x34] sm:$0xf] %vm2892_vm4, %v3417_v12  ;;  %v2008_v30 = vld [vmem:[#allocation2 + $0x98] sm:$0xff]  ;;  %v2204_v36 = vadd.f32 %v4309_v34, %v2069_v29  ;;  %v2334_v41 = vmax.f32 %v2206_v27, 0.0  ;;  %v1755_v63 = vadd.f32 %v3628_v57, %v419_v46 }
 0x119   : > { %1878 = vst.msk [vmem:[#allocation2 + $0xa0] sm:$0xff] %vm264_vm2, %v1749_v15  ;;  %v2143_v37 = vadd.f32 %v4309_v34, %v2008_v30  ;;  %v2072_v38 = vld [vmem:[#allocation2 + $0x298] sm:$0xff]  ;;  %v2006_v39 = vld [vmem:[#allocation2 + $0x88] sm:$0xff]  ;;  %1942 = vst.msk [vmem:[#allocation2 + $0x2a0] sm:$0xff] %vm264_vm2, %v1813_v23  ;;  %v2268_v42 = vmax.f32 %v2140_v28, 0.0  ;;  %v3422_v47 = vpack.c.bf16 %v2270_v35, %v2270_v35  ;;  %v3692_v0 = vpop.f32.mrb[24].mxu1 }
 0x11a   : > { %2970 = vst.msk [vmem:[%s4326_s29 + $0x134] sm:$0xf] %vm2892_vm4, %v3481_v19  ;;  %v2207_v43 = vadd.f32 %v4309_v34, %v2072_v38  ;;  %v2141_v44 = vadd.f32 %v4309_v34, %v2006_v39  ;;  %v2070_v45 = vld [vmem:[#allocation2 + $0x288] sm:$0xff]  ;;  %v2332_v48 = vmax.f32 %v2204_v36, 0.0  ;;  %v417_v52 = vld [vmem:[#allocation2 + $0xc0] sm:$0xff]  ;;  %v3486_v53 = vpack.c.bf16 %v2334_v41, %v2334_v41  ;;  %v420_v59 = vld [vmem:[#allocation2 + $0xd8] sm:$0xff] }
 0x11b   : > { %1881 = vst.msk [vmem:[#allocation2 + $0xb8] sm:$0xff] %vm264_vm2, %v1752_v24  ;;  %1945 = vst.msk [vmem:[#allocation2 + $0x2b8] sm:$0xff] %vm264_vm2, %v1816_v31  ;;  %v2271_v49 = vmax.f32 %v2143_v37, 0.0  ;;  %v2205_v50 = vadd.f32 %v4309_v34, %v2070_v45  ;;  %v3420_v54 = vpack.c.bf16 %v2268_v42, %v2268_v42  ;;  %v481_v58 = vld [vmem:[#allocation2 + $0x2c0] sm:$0xff]  ;;  %v1314_v1 = vpop.f32.mrb[25].mxu0  ;;  %v484_v2 = vld [vmem:[#allocation2 + $0x2d8] sm:$0xff]  ;;  %v1819_v7 = vadd.f32 %v3692_v0, %v483_v51 }
 0x11c   : > { %1879 = vst.msk [vmem:[#allocation2 + $0xa8] sm:$0xff] %vm264_vm2, %v1750_v32  ;;  %1943 = vst.msk [vmem:[#allocation2 + $0x2a8] sm:$0xff] %vm264_vm2, %v1814_v40  ;;  %v2335_v55 = vmax.f32 %v2207_v43, 0.0  ;;  %v2269_v56 = vmax.f32 %v2141_v44, 0.0  ;;  %v3484_v60 = vpack.c.bf16 %v2332_v48, %v2332_v48  ;;  %v418_v3 = vld [vmem:[#allocation2 + $0xc8] sm:$0xff]  ;;  %v1753_v8 = vadd.f32 %v1314_v1, %v417_v52  ;;  %v1570_v9 = vpop.f32.mrb[25].mxu1 }
 0x11d   : > { %2911 = vst.msk [vmem:[%s4326_s29 + $0x48] sm:$0xf] %vm2892_vm4, %v3422_v47  ;;  %v3423_v61 = vpack.c.bf16 %v2271_v49, %v2271_v49  ;;  %v2333_v62 = vmax.f32 %v2205_v50, 0.0  ;;  %2975 = vst.msk [vmem:[%s4326_s29 + $0x148] sm:$0xf] %vm2892_vm4, %v3486_v53  ;;  %v3629_v10 = vpop.f32.mrb[26].mxu0  ;;  %v1817_v16 = vadd.f32 %v1570_v9, %v481_v58 }
 0x11e   : > { %2909 = vst.msk [vmem:[%s4326_s29 + $0x40] sm:$0xf] %vm2892_vm4, %v3420_v54  ;;  %v3487_v4 = vpack.c.bf16 %v2335_v55, %v2335_v55  ;;  %v3421_v5 = vpack.c.bf16 %v2269_v56, %v2269_v56  ;;  %v2011_v6 = vld [vmem:[#allocation2 + $0xb0] sm:$0xff]  ;;  %v482_v11 = vld [vmem:[#allocation2 + $0x2c8] sm:$0xff]  ;;  %2973 = vst.msk [vmem:[%s4326_s29 + $0x140] sm:$0xf] %vm2892_vm4, %v3484_v60  ;;  %v1756_v17 = vadd.f32 %v3629_v10, %v420_v59 }
 0x11f   : > { %2912 = vst.msk [vmem:[%s4326_s29 + $0x4c] sm:$0xf] %vm2892_vm4, %v3423_v61  ;;  %v3485_v12 = vpack.c.bf16 %v2333_v62, %v2333_v62  ;;  %v2146_v13 = vadd.f32 %v4309_v34, %v2011_v6  ;;  %v2075_v14 = vld [vmem:[#allocation2 + $0x2b0] sm:$0xff]  ;;  %v3693_v18 = vpop.f32.mrb[26].mxu1  ;;  %v1317_v19 = vpop.f32.mrb[27].mxu0  ;;  %v421_v45 = vld [vmem:[#allocation2 + $0xe0] sm:$0xff] }
 0x120   : > { %v2009_v15 = vld [vmem:[#allocation2 + $0xa0] sm:$0xff]  ;;  %1884 = vst.msk [vmem:[#allocation2 + $0xd0] sm:$0xff] %vm264_vm2, %v1755_v63  ;;  %v2210_v20 = vadd.f32 %v4309_v34, %v2075_v14  ;;  %1948 = vst.msk [vmem:[#allocation2 + $0x2d0] sm:$0xff] %vm264_vm2, %v1819_v7  ;;  %v1820_v24 = vadd.f32 %v3693_v18, %v484_v2  ;;  %v1754_v25 = vadd.f32 %v1317_v19, %v418_v3  ;;  %v1573_v26 = vpop.f32.mrb[27].mxu1  ;;  %v423_v39 = vld [vmem:[#allocation2 + $0xf0] sm:$0xff]  ;;  %v3632_v50 = vpop.f32.mrb[28].mxu0 }
 0x121   : > { %2976 = vst.msk [vmem:[%s4326_s29 + $0x14c] sm:$0xf] %vm2892_vm4, %v3487_v4  ;;  %2910 = vst.msk [vmem:[%s4326_s29 + $0x44] sm:$0xf] %vm2892_vm4, %v3421_v5  ;;  %v2144_v21 = vadd.f32 %v4309_v34, %v2009_v15  ;;  %v2073_v22 = vld [vmem:[#allocation2 + $0x2a0] sm:$0xff]  ;;  %v2274_v27 = vmax.f32 %v2146_v13, 0.0  ;;  %v1818_v32 = vadd.f32 %v1573_v26, %v482_v11  ;;  %v1759_v56 = vadd.f32 %v3632_v50, %v423_v39 }
 0x122   : > { %v2012_v23 = vld [vmem:[#allocation2 + $0xb8] sm:$0xff]  ;;  %1882 = vst.msk [vmem:[#allocation2 + $0xc0] sm:$0xff] %vm264_vm2, %v1753_v8  ;;  %v2208_v28 = vadd.f32 %v4309_v34, %v2073_v22  ;;  %1946 = vst.msk [vmem:[#allocation2 + $0x2c0] sm:$0xff] %vm264_vm2, %v1817_v16  ;;  %v2338_v33 = vmax.f32 %v2210_v20, 0.0  ;;  %v487_v44 = vld [vmem:[#allocation2 + $0x2f0] sm:$0xff]  ;;  %v3696_v57 = vpop.f32.mrb[28].mxu1 }
 0x123   : > { %2974 = vst.msk [vmem:[%s4326_s29 + $0x144] sm:$0xf] %vm2892_vm4, %v3485_v12  ;;  %v2147_v29 = vadd.f32 %v4309_v34, %v2012_v23  ;;  %v2076_v30 = vld [vmem:[#allocation2 + $0x2b8] sm:$0xff]  ;;  %v2010_v31 = vld [vmem:[#allocation2 + $0xa8] sm:$0xff]  ;;  %v2272_v35 = vmax.f32 %v2144_v21, 0.0  ;;  %v3426_v40 = vpack.c.bf16 %v2274_v27, %v2274_v27  ;;  %v485_v51 = vld [vmem:[#allocation2 + $0x2e0] sm:$0xff]  ;;  %v1823_v0 = vadd.f32 %v3696_v57, %v487_v44 }
 0x124   : > { %1885 = vst.msk [vmem:[#allocation2 + $0xd8] sm:$0xff] %vm264_vm2, %v1756_v17  ;;  %v2211_v36 = vadd.f32 %v4309_v34, %v2076_v30  ;;  %v2145_v37 = vadd.f32 %v4309_v34, %v2010_v31  ;;  %v2074_v38 = vld [vmem:[#allocation2 + $0x2a8] sm:$0xff]  ;;  %1949 = vst.msk [vmem:[#allocation2 + $0x2d8] sm:$0xff] %vm264_vm2, %v1820_v24  ;;  %v2336_v41 = vmax.f32 %v2208_v28, 0.0  ;;  %v3490_v46 = vpack.c.bf16 %v2338_v33, %v2338_v33  ;;  %v424_v52 = vld [vmem:[#allocation2 + $0xf8] sm:$0xff]  ;;  %v1330_v58 = vpop.f32.mrb[29].mxu0 }
 0x125   : > { %1883 = vst.msk [vmem:[#allocation2 + $0xc8] sm:$0xff] %vm264_vm2, %v1754_v25  ;;  %v2275_v42 = vmax.f32 %v2147_v29, 0.0  ;;  %v2209_v43 = vadd.f32 %v4309_v34, %v2074_v38  ;;  %1947 = vst.msk [vmem:[#allocation2 + $0x2c8] sm:$0xff] %vm264_vm2, %v1818_v32  ;;  %v3424_v47 = vpack.c.bf16 %v2272_v35, %v2272_v35  ;;  %v488_v59 = vld [vmem:[#allocation2 + $0x2f8] sm:$0xff]  ;;  %v422_v60 = vld [vmem:[#allocation2 + $0xe8] sm:$0xff]  ;;  %v1757_v1 = vadd.f32 %v1330_v58, %v421_v45  ;;  %v1586_v2 = vpop.f32.mrb[29].mxu1 }
 0x126   : > { %v2339_v48 = vmax.f32 %v2211_v36, 0.0  ;;  %v2273_v49 = vmax.f32 %v2145_v37, 0.0  ;;  %2915 = vst.msk [vmem:[%s4326_s29 + $0x58] sm:$0xf] %vm2892_vm4, %v3426_v40  ;;  %v3488_v53 = vpack.c.bf16 %v2336_v41, %v2336_v41  ;;  %2979 = vst.msk [vmem:[%s4326_s29 + $0x158] sm:$0xf] %vm2892_vm4, %v3490_v46  ;;  %v1821_v9 = vadd.f32 %v1586_v2, %v485_v51 }
 0x127   : > { %v3427_v54 = vpack.c.bf16 %v2275_v42, %v2275_v42  ;;  %v2337_v55 = vmax.f32 %v2209_v43, 0.0  ;;  %2913 = vst.msk [vmem:[%s4326_s29 + $0x50] sm:$0xf] %vm2892_vm4, %v3424_v47  ;;  %v2015_v63 = vld [vmem:[#allocation2 + $0xd0] sm:$0xff]  ;;  %v3633_v3 = vpop.f32.mrb[30].mxu0  ;;  %v486_v4 = vld [vmem:[#allocation2 + $0x2e8] sm:$0xff] }
 0x128   : > { %v3491_v61 = vpack.c.bf16 %v2339_v48, %v2339_v48  ;;  %v3425_v62 = vpack.c.bf16 %v2273_v49, %v2273_v49  ;;  %2977 = vst.msk [vmem:[%s4326_s29 + $0x150] sm:$0xf] %vm2892_vm4, %v3488_v53  ;;  %v2150_v6 = vadd.f32 %v4309_v34, %v2015_v63  ;;  %v2079_v7 = vld [vmem:[#allocation2 + $0x2d0] sm:$0xff]  ;;  %v1760_v10 = vadd.f32 %v3633_v3, %v424_v52  ;;  %v3697_v11 = vpop.f32.mrb[30].mxu1  ;;  %v1333_v12 = vpop.f32.mrb[31].mxu0  ;;  %v425_v38 = vld [vmem:[#allocation2 + $0x100] sm:$0xff] }
 0x129   : > { %2916 = vst.msk [vmem:[%s4326_s29 + $0x5c] sm:$0xf] %vm2892_vm4, %v3427_v54  ;;  %v3489_v5 = vpack.c.bf16 %v2337_v55, %v2337_v55  ;;  %v2013_v8 = vld [vmem:[#allocation2 + $0xc0] sm:$0xff]  ;;  %v2214_v13 = vadd.f32 %v4309_v34, %v2079_v7  ;;  %v1824_v17 = vadd.f32 %v3697_v11, %v488_v59  ;;  %v1758_v18 = vadd.f32 %v1333_v12, %v422_v60  ;;  %v1589_v19 = vpop.f32.mrb[31].mxu1  ;;  %v427_v31 = vld [vmem:[#allocation2 + $0x110] sm:$0xff]  ;;  %v3636_v43 = vpop.f32.mrb[32].mxu0 }
 0x12a   : > { %1888 = vst.msk [vmem:[#allocation2 + $0xf0] sm:$0xff] %vm264_vm2, %v1759_v56  ;;  %v2148_v14 = vadd.f32 %v4309_v34, %v2013_v8  ;;  %v2077_v15 = vld [vmem:[#allocation2 + $0x2c0] sm:$0xff]  ;;  %1952 = vst.msk [vmem:[#allocation2 + $0x2f0] sm:$0xff] %vm264_vm2, %v1823_v0  ;;  %v2278_v20 = vmax.f32 %v2150_v6, 0.0  ;;  %v1822_v25 = vadd.f32 %v1589_v19, %v486_v4  ;;  %v491_v37 = vld [vmem:[#allocation2 + $0x310] sm:$0xff]  ;;  %v3700_v49 = vpop.f32.mrb[32].mxu1 }
 0x12b   : > { %2980 = vst.msk [vmem:[%s4326_s29 + $0x15c] sm:$0xf] %vm2892_vm4, %v3491_v61  ;;  %2914 = vst.msk [vmem:[%s4326_s29 + $0x54] sm:$0xf] %vm2892_vm4, %v3425_v62  ;;  %v2016_v16 = vld [vmem:[#allocation2 + $0xd8] sm:$0xff]  ;;  %v2212_v21 = vadd.f32 %v4309_v34, %v2077_v15  ;;  %v2342_v26 = vmax.f32 %v2214_v13, 0.0  ;;  %v1827_v56 = vadd.f32 %v3700_v49, %v491_v37 }
 0x12c   : > { %1886 = vst.msk [vmem:[#allocation2 + $0xe0] sm:$0xff] %vm264_vm2, %v1757_v1  ;;  %v2151_v22 = vadd.f32 %v4309_v34, %v2016_v16  ;;  %v2080_v23 = vld [vmem:[#allocation2 + $0x2d8] sm:$0xff]  ;;  %v2014_v24 = vld [vmem:[#allocation2 + $0xc8] sm:$0xff]  ;;  %1950 = vst.msk [vmem:[#allocation2 + $0x2e0] sm:$0xff] %vm264_vm2, %v1821_v9  ;;  %v2276_v27 = vmax.f32 %v2148_v14, 0.0  ;;  %v3430_v32 = vpack.c.bf16 %v2278_v20, %v2278_v20  ;;  %v1346_v50 = vpop.f32.mrb[33].mxu0 }
 0x12d   : > { %2978 = vst.msk [vmem:[%s4326_s29 + $0x154] sm:$0xf] %vm2892_vm4, %v3489_v5  ;;  %v2215_v28 = vadd.f32 %v4309_v34, %v2080_v23  ;;  %v2149_v29 = vadd.f32 %v4309_v34, %v2014_v24  ;;  %v2078_v30 = vld [vmem:[#allocation2 + $0x2c8] sm:$0xff]  ;;  %v2340_v33 = vmax.f32 %v2212_v21, 0.0  ;;  %v3494_v39 = vpack.c.bf16 %v2342_v26, %v2342_v26  ;;  %v489_v44 = vld [vmem:[#allocation2 + $0x300] sm:$0xff]  ;;  %v428_v45 = vld [vmem:[#allocation2 + $0x118] sm:$0xff] }
 0x12e   : > { %1889 = vst.msk [vmem:[#allocation2 + $0xf8] sm:$0xff] %vm264_vm2, %v1760_v10  ;;  %1953 = vst.msk [vmem:[#allocation2 + $0x2f8] sm:$0xff] %vm264_vm2, %v1824_v17  ;;  %v2279_v35 = vmax.f32 %v2151_v22, 0.0  ;;  %v2213_v36 = vadd.f32 %v4309_v34, %v2078_v30  ;;  %v3428_v40 = vpack.c.bf16 %v2276_v27, %v2276_v27  ;;  %v1763_v34 = vadd.f32 %v3636_v43, %v427_v31  ;;  %v492_v51 = vld [vmem:[#allocation2 + $0x318] sm:$0xff]  ;;  %v426_v52 = vld [vmem:[#allocation2 + $0x108] sm:$0xff]  ;;  %v1602_v58 = vpop.f32.mrb[33].mxu1 }
 0x12f   : > { %1887 = vst.msk [vmem:[#allocation2 + $0xe8] sm:$0xff] %vm264_vm2, %v1758_v18  ;;  %1951 = vst.msk [vmem:[#allocation2 + $0x2e8] sm:$0xff] %vm264_vm2, %v1822_v25  ;;  %v2343_v41 = vmax.f32 %v2215_v28, 0.0  ;;  %v2277_v42 = vmax.f32 %v2149_v29, 0.0  ;;  %v3492_v46 = vpack.c.bf16 %v2340_v33, %v2340_v33  ;;  %v1761_v57 = vadd.f32 %v1346_v50, %v425_v38  ;;  %v3637_v59 = vpop.f32.mrb[34].mxu0  ;;  %v490_v60 = vld [vmem:[#allocation2 + $0x308] sm:$0xff] }
 0x130   : > { %2919 = vst.msk [vmem:[%s4326_s29 + $0x68] sm:$0xf] %vm2892_vm4, %v3430_v32  ;;  %v3431_v47 = vpack.c.bf16 %v2279_v35, %v2279_v35  ;;  %v2341_v48 = vmax.f32 %v2213_v36, 0.0  ;;  %2983 = vst.msk [vmem:[%s4326_s29 + $0x168] sm:$0xf] %vm2892_vm4, %v3494_v39  ;;  %v1825_v2 = vadd.f32 %v1602_v58, %v489_v44  ;;  %v1764_v3 = vadd.f32 %v3637_v59, %v428_v45  ;;  %v3701_v4 = vpop.f32.mrb[34].mxu1 }
 0x131   : > { %2917 = vst.msk [vmem:[%s4326_s29 + $0x60] sm:$0xf] %vm2892_vm4, %v3428_v40  ;;  %v3495_v53 = vpack.c.bf16 %v2343_v41, %v2343_v41  ;;  %v3429_v54 = vpack.c.bf16 %v2277_v42, %v2277_v42  ;;  %v2019_v55 = vld [vmem:[#allocation2 + $0xf0] sm:$0xff]  ;;  %2981 = vst.msk [vmem:[%s4326_s29 + $0x160] sm:$0xf] %vm2892_vm4, %v3492_v46  ;;  %v1349_v5 = vpop.f32.mrb[35].mxu0  ;;  %v1828_v10 = vadd.f32 %v3701_v4, %v492_v51 }
 0x132   : > { %2920 = vst.msk [vmem:[%s4326_s29 + $0x6c] sm:$0xf] %vm2892_vm4, %v3431_v47  ;;  %v3493_v61 = vpack.c.bf16 %v2341_v48, %v2341_v48  ;;  %v4539_v62 = vld [vmem:[%s4843_s2] ss:$0 sm:$0xff]  ;;  %v2083_v0 = vld [vmem:[#allocation2 + $0x2f0] sm:$0xff]  ;;  %v1762_v11 = vadd.f32 %v1349_v5, %v426_v52  ;;  %v1605_v12 = vpop.f32.mrb[35].mxu1 }
 0x133   : > { %v2154_v63 = vadd.f32 %v4539_v62, %v2019_v55  ;;  %v2017_v1 = vld [vmem:[#allocation2 + $0xe0] sm:$0xff]  ;;  %1892 = vst.msk [vmem:[#allocation2 + $0x110] sm:$0xff] %vm264_vm2, %v1763_v34  ;;  %v2218_v6 = vadd.f32 %v4539_v62, %v2083_v0  ;;  %1956 = vst.msk [vmem:[#allocation2 + $0x310] sm:$0xff] %vm264_vm2, %v1827_v56  ;;  %v1826_v18 = vadd.f32 %v1605_v12, %v490_v60  ;;  %v431_v24 = vld [vmem:[#allocation2 + $0x130] sm:$0xff]  ;;  %v3640_v36 = vpop.f32.mrb[36].mxu0  ;;  %v3704_v43 = vpop.f32.mrb[36].mxu1 }
 0x134   : > { %2984 = vst.msk [vmem:[%s4326_s29 + $0x16c] sm:$0xf] %vm2892_vm4, %v3495_v53  ;;  %2918 = vst.msk [vmem:[%s4326_s29 + $0x64] sm:$0xf] %vm2892_vm4, %v3429_v54  ;;  %v2152_v7 = vadd.f32 %v4539_v62, %v2017_v1  ;;  %v2081_v8 = vld [vmem:[#allocation2 + $0x2e0] sm:$0xff]  ;;  %v495_v29 = vld [vmem:[#allocation2 + $0x330] sm:$0xff]  ;;  %v1767_v42 = vadd.f32 %v3640_v36, %v431_v24 }
 0x135   : > { %v2020_v9 = vld [vmem:[#allocation2 + $0xf8] sm:$0xff]  ;;  %1890 = vst.msk [vmem:[#allocation2 + $0x100] sm:$0xff] %vm264_vm2, %v1761_v57  ;;  %v2282_v13 = vmax.f32 %v2154_v63, 0.0  ;;  %v2216_v14 = vadd.f32 %v4539_v62, %v2081_v8  ;;  %1954 = vst.msk [vmem:[#allocation2 + $0x300] sm:$0xff] %vm264_vm2, %v1825_v2  ;;  %v2346_v19 = vmax.f32 %v2218_v6, 0.0  ;;  %v429_v30 = vld [vmem:[#allocation2 + $0x120] sm:$0xff]  ;;  %v1831_v49 = vadd.f32 %v3704_v43, %v495_v29 }
 0x136   : > { %2982 = vst.msk [vmem:[%s4326_s29 + $0x164] sm:$0xf] %vm2892_vm4, %v3493_v61  ;;  %v2155_v15 = vadd.f32 %v4539_v62, %v2020_v9  ;;  %v2084_v16 = vld [vmem:[#allocation2 + $0x2f8] sm:$0xff]  ;;  %v2018_v17 = vld [vmem:[#allocation2 + $0xe8] sm:$0xff]  ;;  %v2280_v20 = vmax.f32 %v2152_v7, 0.0  ;;  %v493_v37 = vld [vmem:[#allocation2 + $0x320] sm:$0xff] }
 0x137   : > { %1893 = vst.msk [vmem:[#allocation2 + $0x118] sm:$0xff] %vm264_vm2, %v1764_v3  ;;  %v2219_v21 = vadd.f32 %v4539_v62, %v2084_v16  ;;  %v2153_v22 = vadd.f32 %v4539_v62, %v2018_v17  ;;  %v2082_v23 = vld [vmem:[#allocation2 + $0x2e8] sm:$0xff]  ;;  %1957 = vst.msk [vmem:[#allocation2 + $0x318] sm:$0xff] %vm264_vm2, %v1828_v10  ;;  %v3434_v25 = vpack.c.bf16 %v2282_v13, %v2282_v13  ;;  %v2344_v26 = vmax.f32 %v2216_v14, 0.0  ;;  %v432_v38 = vld [vmem:[#allocation2 + $0x138] sm:$0xff]  ;;  %v1362_v44 = vpop.f32.mrb[37].mxu0 }
 0x138   : > { %1891 = vst.msk [vmem:[#allocation2 + $0x108] sm:$0xff] %vm264_vm2, %v1762_v11  ;;  %v2283_v27 = vmax.f32 %v2155_v15, 0.0  ;;  %v2217_v28 = vadd.f32 %v4539_v62, %v2082_v23  ;;  %1955 = vst.msk [vmem:[#allocation2 + $0x308] sm:$0xff] %vm264_vm2, %v1826_v18  ;;  %v3498_v31 = vpack.c.bf16 %v2346_v19, %v2346_v19  ;;  %v3432_v32 = vpack.c.bf16 %v2280_v20, %v2280_v20  ;;  %v496_v45 = vld [vmem:[#allocation2 + $0x338] sm:$0xff]  ;;  %v430_v46 = vld [vmem:[#allocation2 + $0x128] sm:$0xff]  ;;  %v1618_v51 = vpop.f32.mrb[37].mxu1 }
 0x139   : > { %v2347_v33 = vmax.f32 %v2219_v21, 0.0  ;;  %v2281_v35 = vmax.f32 %v2153_v22, 0.0  ;;  %2923 = vst.msk [vmem:[%s4326_s29 + $0x78] sm:$0xf] %vm2892_vm4, %v3434_v25  ;;  %v3496_v39 = vpack.c.bf16 %v2344_v26, %v2344_v26  ;;  %v1765_v50 = vadd.f32 %v1362_v44, %v429_v30  ;;  %v3641_v52 = vpop.f32.mrb[38].mxu0  ;;  %v494_v53 = vld [vmem:[#allocation2 + $0x328] sm:$0xff] }
 0x13a   : > { %v3435_v40 = vpack.c.bf16 %v2283_v27, %v2283_v27  ;;  %v2345_v41 = vmax.f32 %v2217_v28, 0.0  ;;  %2987 = vst.msk [vmem:[%s4326_s29 + $0x178] sm:$0xf] %vm2892_vm4, %v3498_v31  ;;  %2921 = vst.msk [vmem:[%s4326_s29 + $0x70] sm:$0xf] %vm2892_vm4, %v3432_v32  ;;  %v2023_v34 = vld [vmem:[#allocation2 + $0x110] sm:$0xff]  ;;  %v1829_v58 = vadd.f32 %v1618_v51, %v493_v37  ;;  %v1768_v59 = vadd.f32 %v3641_v52, %v432_v38 }
 0x13b   : > { %v3499_v47 = vpack.c.bf16 %v2347_v33, %v2347_v33  ;;  %v3433_v48 = vpack.c.bf16 %v2281_v35, %v2281_v35  ;;  %2985 = vst.msk [vmem:[%s4326_s29 + $0x170] sm:$0xf] %vm2892_vm4, %v3496_v39  ;;  %v2158_v55 = vadd.f32 %v4539_v62, %v2023_v34  ;;  %v2087_v56 = vld [vmem:[#allocation2 + $0x310] sm:$0xff]  ;;  %v3705_v60 = vpop.f32.mrb[38].mxu1  ;;  %v1365_v61 = vpop.f32.mrb[39].mxu0  ;;  %v433_v23 = vld [vmem:[#allocation2 + $0x140] sm:$0xff] }
 0x13c   : > { %2924 = vst.msk [vmem:[%s4326_s29 + $0x7c] sm:$0xf] %vm2892_vm4, %v3435_v40  ;;  %v3497_v54 = vpack.c.bf16 %v2345_v41, %v2345_v41  ;;  %v2021_v57 = vld [vmem:[#allocation2 + $0x100] sm:$0xff]  ;;  %v2222_v63 = vadd.f32 %v4539_v62, %v2087_v56  ;;  %v1832_v3 = vadd.f32 %v3705_v60, %v496_v45  ;;  %v1766_v4 = vadd.f32 %v1365_v61, %v430_v46  ;;  %v1621_v5 = vpop.f32.mrb[39].mxu1  ;;  %v435_v17 = vld [vmem:[#allocation2 + $0x150] sm:$0xff]  ;;  %v3644_v28 = vpop.f32.mrb[40].mxu0 }
 0x13d   : > { %1896 = vst.msk [vmem:[#allocation2 + $0x130] sm:$0xff] %vm264_vm2, %v1767_v42  ;;  %v2156_v0 = vadd.f32 %v4539_v62, %v2021_v57  ;;  %v2085_v1 = vld [vmem:[#allocation2 + $0x300] sm:$0xff]  ;;  %1960 = vst.msk [vmem:[#allocation2 + $0x330] sm:$0xff] %vm264_vm2, %v1831_v49  ;;  %v2286_v6 = vmax.f32 %v2158_v55, 0.0  ;;  %v1830_v11 = vadd.f32 %v1621_v5, %v494_v53  ;;  %v499_v22 = vld [vmem:[#allocation2 + $0x350] sm:$0xff]  ;;  %v1771_v35 = vadd.f32 %v3644_v28, %v435_v17  ;;  %v3708_v36 = vpop.f32.mrb[40].mxu1 }
 0x13e   : > { %2988 = vst.msk [vmem:[%s4326_s29 + $0x17c] sm:$0xf] %vm2892_vm4, %v3499_v47  ;;  %2922 = vst.msk [vmem:[%s4326_s29 + $0x74] sm:$0xf] %vm2892_vm4, %v3433_v48  ;;  %v2024_v2 = vld [vmem:[#allocation2 + $0x118] sm:$0xff]  ;;  %v2220_v7 = vadd.f32 %v4539_v62, %v2085_v1  ;;  %v2350_v12 = vmax.f32 %v2222_v63, 0.0  ;;  %v1835_v43 = vadd.f32 %v3708_v36, %v499_v22 }
 0x13f   : > { %1894 = vst.msk [vmem:[#allocation2 + $0x120] sm:$0xff] %vm264_vm2, %v1765_v50  ;;  %v2159_v8 = vadd.f32 %v4539_v62, %v2024_v2  ;;  %v2088_v9 = vld [vmem:[#allocation2 + $0x318] sm:$0xff]  ;;  %v2022_v10 = vld [vmem:[#allocation2 + $0x108] sm:$0xff]  ;;  %1958 = vst.msk [vmem:[#allocation2 + $0x320] sm:$0xff] %vm264_vm2, %v1829_v58  ;;  %v2284_v13 = vmax.f32 %v2156_v0, 0.0  ;;  %v3438_v18 = vpack.c.bf16 %v2286_v6, %v2286_v6  ;;  %v1378_v37 = vpop.f32.mrb[41].mxu0 }
 0x140   : > { %2986 = vst.msk [vmem:[%s4326_s29 + $0x174] sm:$0xf] %vm2892_vm4, %v3497_v54  ;;  %v2223_v14 = vadd.f32 %v4539_v62, %v2088_v9  ;;  %v2157_v15 = vadd.f32 %v4539_v62, %v2022_v10  ;;  %v2086_v16 = vld [vmem:[#allocation2 + $0x308] sm:$0xff]  ;;  %v2348_v19 = vmax.f32 %v2220_v7, 0.0  ;;  %v3502_v24 = vpack.c.bf16 %v2350_v12, %v2350_v12  ;;  %v497_v29 = vld [vmem:[#allocation2 + $0x340] sm:$0xff]  ;;  %v436_v30 = vld [vmem:[#allocation2 + $0x158] sm:$0xff] }
 0x141   : > { %1897 = vst.msk [vmem:[#allocation2 + $0x138] sm:$0xff] %vm264_vm2, %v1768_v59  ;;  %1961 = vst.msk [vmem:[#allocation2 + $0x338] sm:$0xff] %vm264_vm2, %v1832_v3  ;;  %v2287_v20 = vmax.f32 %v2159_v8, 0.0  ;;  %v2221_v21 = vadd.f32 %v4539_v62, %v2086_v16  ;;  %v3436_v25 = vpack.c.bf16 %v2284_v13, %v2284_v13  ;;  %v500_v38 = vld [vmem:[#allocation2 + $0x358] sm:$0xff]  ;;  %v434_v39 = vld [vmem:[#allocation2 + $0x148] sm:$0xff]  ;;  %v1769_v44 = vadd.f32 %v1378_v37, %v433_v23  ;;  %v1634_v45 = vpop.f32.mrb[41].mxu1 }
 0x142   : > { %1895 = vst.msk [vmem:[#allocation2 + $0x128] sm:$0xff] %vm264_vm2, %v1766_v4  ;;  %1959 = vst.msk [vmem:[#allocation2 + $0x328] sm:$0xff] %vm264_vm2, %v1830_v11  ;;  %v2351_v26 = vmax.f32 %v2223_v14, 0.0  ;;  %v2285_v27 = vmax.f32 %v2157_v15, 0.0  ;;  %v3500_v31 = vpack.c.bf16 %v2348_v19, %v2348_v19  ;;  %v3645_v46 = vpop.f32.mrb[42].mxu0  ;;  %v498_v47 = vld [vmem:[#allocation2 + $0x348] sm:$0xff]  ;;  %v1833_v51 = vadd.f32 %v1634_v45, %v497_v29 }
 0x143   : > { %2927 = vst.msk [vmem:[%s4326_s29 + $0x88] sm:$0xf] %vm2892_vm4, %v3438_v18  ;;  %v3439_v32 = vpack.c.bf16 %v2287_v20, %v2287_v20  ;;  %v2349_v33 = vmax.f32 %v2221_v21, 0.0  ;;  %2991 = vst.msk [vmem:[%s4326_s29 + $0x188] sm:$0xf] %vm2892_vm4, %v3502_v24  ;;  %v1772_v52 = vadd.f32 %v3645_v46, %v436_v30  ;;  %v3709_v53 = vpop.f32.mrb[42].mxu1 }
 0x144   : > { %2925 = vst.msk [vmem:[%s4326_s29 + $0x80] sm:$0xf] %vm2892_vm4, %v3436_v25  ;;  %v3503_v40 = vpack.c.bf16 %v2351_v26, %v2351_v26  ;;  %v3437_v41 = vpack.c.bf16 %v2285_v27, %v2285_v27  ;;  %v2027_v42 = vld [vmem:[#allocation2 + $0x130] sm:$0xff]  ;;  %2989 = vst.msk [vmem:[%s4326_s29 + $0x180] sm:$0xf] %vm2892_vm4, %v3500_v31  ;;  %v1381_v54 = vpop.f32.mrb[43].mxu0  ;;  %v1836_v59 = vadd.f32 %v3709_v53, %v500_v38 }
 0x145   : > { %2928 = vst.msk [vmem:[%s4326_s29 + $0x8c] sm:$0xf] %vm2892_vm4, %v3439_v32  ;;  %v3501_v48 = vpack.c.bf16 %v2349_v33, %v2349_v33  ;;  %v2162_v34 = vadd.f32 %v4539_v62, %v2027_v42  ;;  %v2091_v49 = vld [vmem:[#allocation2 + $0x330] sm:$0xff]  ;;  %v1770_v60 = vadd.f32 %v1381_v54, %v434_v39  ;;  %v1637_v61 = vpop.f32.mrb[43].mxu1  ;;  %v437_v16 = vld [vmem:[#allocation2 + $0x160] sm:$0xff]  ;;  %v3648_v21 = vpop.f32.mrb[44].mxu0 }
 0x146   : > { %v2025_v50 = vld [vmem:[#allocation2 + $0x120] sm:$0xff]  ;;  %1900 = vst.msk [vmem:[#allocation2 + $0x150] sm:$0xff] %vm264_vm2, %v1771_v35  ;;  %v2226_v55 = vadd.f32 %v4539_v62, %v2091_v49  ;;  %1964 = vst.msk [vmem:[#allocation2 + $0x350] sm:$0xff] %vm264_vm2, %v1835_v43  ;;  %v1834_v4 = vadd.f32 %v1637_v61, %v498_v47  ;;  %v439_v10 = vld [vmem:[#allocation2 + $0x170] sm:$0xff]  ;;  %v3712_v28 = vpop.f32.mrb[44].mxu1  ;;  %v1394_v29 = vpop.f32.mrb[45].mxu0 }
 0x147   : > { %2992 = vst.msk [vmem:[%s4326_s29 + $0x18c] sm:$0xf] %vm2892_vm4, %v3503_v40  ;;  %2926 = vst.msk [vmem:[%s4326_s29 + $0x84] sm:$0xf] %vm2892_vm4, %v3437_v41  ;;  %v2160_v56 = vadd.f32 %v4539_v62, %v2025_v50  ;;  %v2089_v57 = vld [vmem:[#allocation2 + $0x320] sm:$0xff]  ;;  %v2290_v63 = vmax.f32 %v2162_v34, 0.0  ;;  %v1775_v27 = vadd.f32 %v3648_v21, %v439_v10  ;;  %v1773_v37 = vadd.f32 %v1394_v29, %v437_v16 }
 0x148   : > { %v2028_v58 = vld [vmem:[#allocation2 + $0x138] sm:$0xff]  ;;  %1898 = vst.msk [vmem:[#allocation2 + $0x140] sm:$0xff] %vm264_vm2, %v1769_v44  ;;  %v2224_v0 = vadd.f32 %v4539_v62, %v2089_v57  ;;  %1962 = vst.msk [vmem:[#allocation2 + $0x340] sm:$0xff] %vm264_vm2, %v1833_v51  ;;  %v2354_v5 = vmax.f32 %v2226_v55, 0.0  ;;  %v503_v15 = vld [vmem:[#allocation2 + $0x370] sm:$0xff]  ;;  %v1650_v38 = vpop.f32.mrb[45].mxu1 }
 0x149   : > { %2990 = vst.msk [vmem:[%s4326_s29 + $0x184] sm:$0xf] %vm2892_vm4, %v3501_v48  ;;  %v2163_v1 = vadd.f32 %v4539_v62, %v2028_v58  ;;  %v2092_v2 = vld [vmem:[#allocation2 + $0x338] sm:$0xff]  ;;  %v2026_v3 = vld [vmem:[#allocation2 + $0x128] sm:$0xff]  ;;  %v2288_v6 = vmax.f32 %v2160_v56, 0.0  ;;  %v3442_v11 = vpack.c.bf16 %v2290_v63, %v2290_v63  ;;  %v501_v22 = vld [vmem:[#allocation2 + $0x360] sm:$0xff]  ;;  %v1839_v36 = vadd.f32 %v3712_v28, %v503_v15 }
 0x14a   : > { %1901 = vst.msk [vmem:[#allocation2 + $0x158] sm:$0xff] %vm264_vm2, %v1772_v52  ;;  %v2227_v7 = vadd.f32 %v4539_v62, %v2092_v2  ;;  %v2161_v8 = vadd.f32 %v4539_v62, %v2026_v3  ;;  %v2090_v9 = vld [vmem:[#allocation2 + $0x328] sm:$0xff]  ;;  %1965 = vst.msk [vmem:[#allocation2 + $0x358] sm:$0xff] %vm264_vm2, %v1836_v59  ;;  %v2352_v12 = vmax.f32 %v2224_v0, 0.0  ;;  %v3506_v17 = vpack.c.bf16 %v2354_v5, %v2354_v5  ;;  %v440_v23 = vld [vmem:[#allocation2 + $0x178] sm:$0xff]  ;;  %v3649_v39 = vpop.f32.mrb[46].mxu0 }
 0x14b   : > { %1899 = vst.msk [vmem:[#allocation2 + $0x148] sm:$0xff] %vm264_vm2, %v1770_v60  ;;  %v2291_v13 = vmax.f32 %v2163_v1, 0.0  ;;  %v2225_v14 = vadd.f32 %v4539_v62, %v2090_v9  ;;  %1963 = vst.msk [vmem:[#allocation2 + $0x348] sm:$0xff] %vm264_vm2, %v1834_v4  ;;  %v3440_v18 = vpack.c.bf16 %v2288_v6, %v2288_v6  ;;  %v504_v30 = vld [vmem:[#allocation2 + $0x378] sm:$0xff]  ;;  %v438_v31 = vld [vmem:[#allocation2 + $0x168] sm:$0xff]  ;;  %v1837_v45 = vadd.f32 %v1650_v38, %v501_v22  ;;  %v3713_v47 = vpop.f32.mrb[46].mxu1 }
 0x14c   : > { %v2355_v19 = vmax.f32 %v2227_v7, 0.0  ;;  %v2289_v20 = vmax.f32 %v2161_v8, 0.0  ;;  %2931 = vst.msk [vmem:[%s4326_s29 + $0x98] sm:$0xf] %vm2892_vm4, %v3442_v11  ;;  %v3504_v24 = vpack.c.bf16 %v2352_v12, %v2352_v12  ;;  %2995 = vst.msk [vmem:[%s4326_s29 + $0x198] sm:$0xf] %vm2892_vm4, %v3506_v17  ;;  %v1776_v46 = vadd.f32 %v3649_v39, %v440_v23 }
 0x14d   : > { %v3443_v25 = vpack.c.bf16 %v2291_v13, %v2291_v13  ;;  %v2353_v26 = vmax.f32 %v2225_v14, 0.0  ;;  %2929 = vst.msk [vmem:[%s4326_s29 + $0x90] sm:$0xf] %vm2892_vm4, %v3440_v18  ;;  %v2031_v35 = vld [vmem:[#allocation2 + $0x150] sm:$0xff]  ;;  %v502_v40 = vld [vmem:[#allocation2 + $0x368] sm:$0xff]  ;;  %v1397_v48 = vpop.f32.mrb[47].mxu0  ;;  %v1840_v52 = vadd.f32 %v3713_v47, %v504_v30 }
 0x14e   : > { %v3507_v32 = vpack.c.bf16 %v2355_v19, %v2355_v19  ;;  %v3441_v33 = vpack.c.bf16 %v2289_v20, %v2289_v20  ;;  %2993 = vst.msk [vmem:[%s4326_s29 + $0x190] sm:$0xf] %vm2892_vm4, %v3504_v24  ;;  %v2166_v42 = vadd.f32 %v4539_v62, %v2031_v35  ;;  %v2095_v43 = vld [vmem:[#allocation2 + $0x350] sm:$0xff]  ;;  %v1774_v53 = vadd.f32 %v1397_v48, %v438_v31  ;;  %v1653_v54 = vpop.f32.mrb[47].mxu1  ;;  %v441_v9 = vld [vmem:[#allocation2 + $0x180] sm:$0xff]  ;;  %v3652_v14 = vpop.f32.mrb[48].mxu0 }
 0x14f   : > { %2932 = vst.msk [vmem:[%s4326_s29 + $0x9c] sm:$0xf] %vm2892_vm4, %v3443_v25  ;;  %v3505_v41 = vpack.c.bf16 %v2353_v26, %v2353_v26  ;;  %v2029_v44 = vld [vmem:[#allocation2 + $0x140] sm:$0xff]  ;;  %v2230_v34 = vadd.f32 %v4539_v62, %v2095_v43  ;;  %v1838_v60 = vadd.f32 %v1653_v54, %v502_v40  ;;  %v443_v3 = vld [vmem:[#allocation2 + $0x190] sm:$0xff]  ;;  %v444_v16 = vld [vmem:[#allocation2 + $0x198] sm:$0xff]  ;;  %v3716_v21 = vpop.f32.mrb[48].mxu1 }
 0x150   : > { %1904 = vst.msk [vmem:[#allocation2 + $0x170] sm:$0xff] %vm264_vm2, %v1775_v27  ;;  %v2164_v49 = vadd.f32 %v4539_v62, %v2029_v44  ;;  %v2093_v50 = vld [vmem:[#allocation2 + $0x340] sm:$0xff]  ;;  %1968 = vst.msk [vmem:[#allocation2 + $0x370] sm:$0xff] %vm264_vm2, %v1839_v36  ;;  %v2294_v55 = vmax.f32 %v2166_v42, 0.0  ;;  %v507_v8 = vld [vmem:[#allocation2 + $0x390] sm:$0xff]  ;;  %v1779_v20 = vadd.f32 %v3652_v14, %v443_v3  ;;  %v1410_v22 = vpop.f32.mrb[49].mxu0 }
 0x151   : > { %2996 = vst.msk [vmem:[%s4326_s29 + $0x19c] sm:$0xf] %vm2892_vm4, %v3507_v32  ;;  %2930 = vst.msk [vmem:[%s4326_s29 + $0x94] sm:$0xf] %vm2892_vm4, %v3441_v33  ;;  %v2032_v51 = vld [vmem:[#allocation2 + $0x158] sm:$0xff]  ;;  %v2228_v56 = vadd.f32 %v4539_v62, %v2093_v50  ;;  %v2358_v61 = vmax.f32 %v2230_v34, 0.0  ;;  %v1843_v28 = vadd.f32 %v3716_v21, %v507_v8  ;;  %v1777_v29 = vadd.f32 %v1410_v22, %v441_v9 }
 0x152   : > { %1902 = vst.msk [vmem:[#allocation2 + $0x160] sm:$0xff] %vm264_vm2, %v1773_v37  ;;  %v2167_v57 = vadd.f32 %v4539_v62, %v2032_v51  ;;  %v2096_v58 = vld [vmem:[#allocation2 + $0x358] sm:$0xff]  ;;  %v2030_v59 = vld [vmem:[#allocation2 + $0x148] sm:$0xff]  ;;  %1966 = vst.msk [vmem:[#allocation2 + $0x360] sm:$0xff] %vm264_vm2, %v1837_v45  ;;  %v2292_v63 = vmax.f32 %v2164_v49, 0.0  ;;  %v3446_v4 = vpack.c.bf16 %v2294_v55, %v2294_v55  ;;  %v1666_v30 = vpop.f32.mrb[49].mxu1 }
 0x153   : > { %2994 = vst.msk [vmem:[%s4326_s29 + $0x194] sm:$0xf] %vm2892_vm4, %v3505_v41  ;;  %v2231_v0 = vadd.f32 %v4539_v62, %v2096_v58  ;;  %v2165_v1 = vadd.f32 %v4539_v62, %v2030_v59  ;;  %v2094_v2 = vld [vmem:[#allocation2 + $0x348] sm:$0xff]  ;;  %v2356_v5 = vmax.f32 %v2228_v56, 0.0  ;;  %v3510_v10 = vpack.c.bf16 %v2358_v61, %v2358_v61  ;;  %v505_v15 = vld [vmem:[#allocation2 + $0x380] sm:$0xff]  ;;  %v508_v23 = vld [vmem:[#allocation2 + $0x398] sm:$0xff] }
 0x154   : > { %1905 = vst.msk [vmem:[#allocation2 + $0x178] sm:$0xff] %vm264_vm2, %v1776_v46  ;;  %1969 = vst.msk [vmem:[#allocation2 + $0x378] sm:$0xff] %vm264_vm2, %v1840_v52  ;;  %v2295_v6 = vmax.f32 %v2167_v57, 0.0  ;;  %v2229_v7 = vadd.f32 %v4539_v62, %v2094_v2  ;;  %v3444_v11 = vpack.c.bf16 %v2292_v63, %v2292_v63  ;;  %v442_v24 = vld [vmem:[#allocation2 + $0x188] sm:$0xff]  ;;  %v3653_v31 = vpop.f32.mrb[50].mxu0  ;;  %v1841_v38 = vadd.f32 %v1666_v30, %v505_v15  ;;  %v3717_v40 = vpop.f32.mrb[50].mxu1 }
 0x155   : > { %1903 = vst.msk [vmem:[#allocation2 + $0x168] sm:$0xff] %vm264_vm2, %v1774_v53  ;;  %1967 = vst.msk [vmem:[#allocation2 + $0x368] sm:$0xff] %vm264_vm2, %v1838_v60  ;;  %v2359_v12 = vmax.f32 %v2231_v0, 0.0  ;;  %v2293_v13 = vmax.f32 %v2165_v1, 0.0  ;;  %v3508_v17 = vpack.c.bf16 %v2356_v5, %v2356_v5  ;;  %v506_v32 = vld [vmem:[#allocation2 + $0x388] sm:$0xff]  ;;  %v1780_v39 = vadd.f32 %v3653_v31, %v444_v16  ;;  %v1413_v41 = vpop.f32.mrb[51].mxu0 }
 0x156   : > { %2935 = vst.msk [vmem:[%s4326_s29 + $0xa8] sm:$0xf] %vm2892_vm4, %v3446_v4  ;;  %v3447_v18 = vpack.c.bf16 %v2295_v6, %v2295_v6  ;;  %v2357_v19 = vmax.f32 %v2229_v7, 0.0  ;;  %2999 = vst.msk [vmem:[%s4326_s29 + $0x1a8] sm:$0xf] %vm2892_vm4, %v3510_v10  ;;  %v1844_v46 = vadd.f32 %v3717_v40, %v508_v23  ;;  %v1778_v47 = vadd.f32 %v1413_v41, %v442_v24  ;;  %v1669_v48 = vpop.f32.mrb[51].mxu1 }
 0x157   : > { %2933 = vst.msk [vmem:[%s4326_s29 + $0xa0] sm:$0xf] %vm2892_vm4, %v3444_v11  ;;  %v3511_v25 = vpack.c.bf16 %v2359_v12, %v2359_v12  ;;  %v3445_v26 = vpack.c.bf16 %v2293_v13, %v2293_v13  ;;  %v2035_v27 = vld [vmem:[#allocation2 + $0x170] sm:$0xff]  ;;  %2997 = vst.msk [vmem:[%s4326_s29 + $0x1a0] sm:$0xf] %vm2892_vm4, %v3508_v17  ;;  %v1842_v53 = vadd.f32 %v1669_v48, %v506_v32  ;;  %v445_v2 = vld [vmem:[#allocation2 + $0x1a0] sm:$0xff] }
 0x158   : > { %2936 = vst.msk [vmem:[%s4326_s29 + $0xac] sm:$0xf] %vm2892_vm4, %v3447_v18  ;;  %v3509_v33 = vpack.c.bf16 %v2357_v19, %v2357_v19  ;;  %v2170_v35 = vadd.f32 %v4539_v62, %v2035_v27  ;;  %v2099_v36 = vld [vmem:[#allocation2 + $0x370] sm:$0xff]  ;;  %v3656_v7 = vpop.f32.mrb[52].mxu0  ;;  %v509_v8 = vld [vmem:[#allocation2 + $0x3a0] sm:$0xff]  ;;  %v448_v9 = vld [vmem:[#allocation2 + $0x1b8] sm:$0xff] }
 0x159   : > { %v2033_v37 = vld [vmem:[#allocation2 + $0x160] sm:$0xff]  ;;  %1908 = vst.msk [vmem:[#allocation2 + $0x190] sm:$0xff] %vm264_vm2, %v1779_v20  ;;  %v2234_v42 = vadd.f32 %v4539_v62, %v2099_v36  ;;  %1972 = vst.msk [vmem:[#allocation2 + $0x390] sm:$0xff] %vm264_vm2, %v1843_v28  ;;  %v447_v59 = vld [vmem:[#allocation2 + $0x1b0] sm:$0xff]  ;;  %v3720_v14 = vpop.f32.mrb[52].mxu1  ;;  %v1426_v15 = vpop.f32.mrb[53].mxu0 }
 0x15a   : > { %3000 = vst.msk [vmem:[%s4326_s29 + $0x1ac] sm:$0xf] %vm2892_vm4, %v3511_v25  ;;  %2934 = vst.msk [vmem:[%s4326_s29 + $0xa4] sm:$0xf] %vm2892_vm4, %v3445_v26  ;;  %v2168_v43 = vadd.f32 %v4539_v62, %v2033_v37  ;;  %v2097_v44 = vld [vmem:[#allocation2 + $0x360] sm:$0xff]  ;;  %v2298_v34 = vmax.f32 %v2170_v35, 0.0  ;;  %v1783_v13 = vadd.f32 %v3656_v7, %v447_v59  ;;  %v1781_v22 = vadd.f32 %v1426_v15, %v445_v2 }
 0x15b   : > { %v2036_v45 = vld [vmem:[#allocation2 + $0x178] sm:$0xff]  ;;  %1906 = vst.msk [vmem:[#allocation2 + $0x180] sm:$0xff] %vm264_vm2, %v1777_v29  ;;  %v2232_v49 = vadd.f32 %v4539_v62, %v2097_v44  ;;  %1970 = vst.msk [vmem:[#allocation2 + $0x380] sm:$0xff] %vm264_vm2, %v1841_v38  ;;  %v2362_v54 = vmax.f32 %v2234_v42, 0.0  ;;  %v511_v1 = vld [vmem:[#allocation2 + $0x3b0] sm:$0xff]  ;;  %v1682_v23 = vpop.f32.mrb[53].mxu1 }
 0x15c   : > { %2998 = vst.msk [vmem:[%s4326_s29 + $0x1a4] sm:$0xf] %vm2892_vm4, %v3509_v33  ;;  %v2171_v50 = vadd.f32 %v4539_v62, %v2036_v45  ;;  %v2100_v51 = vld [vmem:[#allocation2 + $0x378] sm:$0xff]  ;;  %v2034_v52 = vld [vmem:[#allocation2 + $0x168] sm:$0xff]  ;;  %v2296_v55 = vmax.f32 %v2168_v43, 0.0  ;;  %v3450_v60 = vpack.c.bf16 %v2298_v34, %v2298_v34  ;;  %v1847_v21 = vadd.f32 %v3720_v14, %v511_v1  ;;  %v3657_v24 = vpop.f32.mrb[54].mxu0 }
 0x15d   : > { %1909 = vst.msk [vmem:[#allocation2 + $0x198] sm:$0xff] %vm264_vm2, %v1780_v39  ;;  %v2235_v56 = vadd.f32 %v4539_v62, %v2100_v51  ;;  %v2169_v57 = vadd.f32 %v4539_v62, %v2034_v52  ;;  %v2098_v58 = vld [vmem:[#allocation2 + $0x368] sm:$0xff]  ;;  %1973 = vst.msk [vmem:[#allocation2 + $0x398] sm:$0xff] %vm264_vm2, %v1844_v46  ;;  %v2360_v61 = vmax.f32 %v2232_v49, 0.0  ;;  %v3514_v3 = vpack.c.bf16 %v2362_v54, %v2362_v54  ;;  %v512_v16 = vld [vmem:[#allocation2 + $0x3b8] sm:$0xff]  ;;  %v3721_v32 = vpop.f32.mrb[54].mxu1 }
 0x15e   : > { %1907 = vst.msk [vmem:[#allocation2 + $0x188] sm:$0xff] %vm264_vm2, %v1778_v47  ;;  %v2299_v63 = vmax.f32 %v2171_v50, 0.0  ;;  %v2233_v0 = vadd.f32 %v4539_v62, %v2098_v58  ;;  %1971 = vst.msk [vmem:[#allocation2 + $0x388] sm:$0xff] %vm264_vm2, %v1842_v53  ;;  %v3448_v4 = vpack.c.bf16 %v2296_v55, %v2296_v55  ;;  %v446_v17 = vld [vmem:[#allocation2 + $0x1a8] sm:$0xff]  ;;  %v1845_v30 = vadd.f32 %v1682_v23, %v509_v8  ;;  %v1429_v33 = vpop.f32.mrb[55].mxu0  ;;  %v1685_v41 = vpop.f32.mrb[55].mxu1 }
 0x15f   : > { %v2363_v5 = vmax.f32 %v2235_v56, 0.0  ;;  %v2297_v6 = vmax.f32 %v2169_v57, 0.0  ;;  %2939 = vst.msk [vmem:[%s4326_s29 + $0xb8] sm:$0xf] %vm2892_vm4, %v3450_v60  ;;  %v3512_v10 = vpack.c.bf16 %v2360_v61, %v2360_v61  ;;  %3003 = vst.msk [vmem:[%s4326_s29 + $0x1b8] sm:$0xf] %vm2892_vm4, %v3514_v3  ;;  %v1784_v31 = vadd.f32 %v3657_v24, %v448_v9 }
 0x160   : > { %v3451_v11 = vpack.c.bf16 %v2299_v63, %v2299_v63  ;;  %v2361_v12 = vmax.f32 %v2233_v0, 0.0  ;;  %2937 = vst.msk [vmem:[%s4326_s29 + $0xb0] sm:$0xf] %vm2892_vm4, %v3448_v4  ;;  %v2039_v20 = vld [vmem:[#allocation2 + $0x190] sm:$0xff]  ;;  %v510_v25 = vld [vmem:[#allocation2 + $0x3a8] sm:$0xff]  ;;  %v1848_v39 = vadd.f32 %v3721_v32, %v512_v16  ;;  %v1782_v40 = vadd.f32 %v1429_v33, %v446_v17  ;;  %v449_v58 = vld [vmem:[#allocation2 + $0x1c0] sm:$0xff] }
 0x161   : > { %v3515_v18 = vpack.c.bf16 %v2363_v5, %v2363_v5  ;;  %v3449_v19 = vpack.c.bf16 %v2297_v6, %v2297_v6  ;;  %3001 = vst.msk [vmem:[%s4326_s29 + $0x1b0] sm:$0xf] %vm2892_vm4, %v3512_v10  ;;  %v2174_v27 = vadd.f32 %v4539_v62, %v2039_v20  ;;  %v2103_v28 = vld [vmem:[#allocation2 + $0x390] sm:$0xff]  ;;  %v1846_v47 = vadd.f32 %v1685_v41, %v510_v25  ;;  %v3660_v0 = vpop.f32.mrb[56].mxu0  ;;  %v513_v1 = vld [vmem:[#allocation2 + $0x3c0] sm:$0xff]  ;;  %v452_v2 = vld [vmem:[#allocation2 + $0x1d8] sm:$0xff] }
 0x162   : > { %2940 = vst.msk [vmem:[%s4326_s29 + $0xbc] sm:$0xf] %vm2892_vm4, %v3451_v11  ;;  %v3513_v26 = vpack.c.bf16 %v2361_v12, %v2361_v12  ;;  %v2037_v29 = vld [vmem:[#allocation2 + $0x180] sm:$0xff]  ;;  %v2238_v35 = vadd.f32 %v4539_v62, %v2103_v28  ;;  %v451_v52 = vld [vmem:[#allocation2 + $0x1d0] sm:$0xff]  ;;  %v3724_v7 = vpop.f32.mrb[56].mxu1  ;;  %v1442_v8 = vpop.f32.mrb[57].mxu0 }
 0x163   : > { %1912 = vst.msk [vmem:[#allocation2 + $0x1b0] sm:$0xff] %vm264_vm2, %v1783_v13  ;;  %v2172_v36 = vadd.f32 %v4539_v62, %v2037_v29  ;;  %v2101_v37 = vld [vmem:[#allocation2 + $0x380] sm:$0xff]  ;;  %1976 = vst.msk [vmem:[#allocation2 + $0x3b0] sm:$0xff] %vm264_vm2, %v1847_v21  ;;  %v2302_v42 = vmax.f32 %v2174_v27, 0.0  ;;  %v515_v57 = vld [vmem:[#allocation2 + $0x3d0] sm:$0xff]  ;;  %v1787_v6 = vadd.f32 %v3660_v0, %v451_v52  ;;  %v1785_v15 = vadd.f32 %v1442_v8, %v449_v58  ;;  %v1698_v16 = vpop.f32.mrb[57].mxu1 }
 0x164   : > { %3004 = vst.msk [vmem:[%s4326_s29 + $0x1bc] sm:$0xf] %vm2892_vm4, %v3515_v18  ;;  %2938 = vst.msk [vmem:[%s4326_s29 + $0xb4] sm:$0xf] %vm2892_vm4, %v3449_v19  ;;  %v2040_v38 = vld [vmem:[#allocation2 + $0x198] sm:$0xff]  ;;  %v2236_v43 = vadd.f32 %v4539_v62, %v2101_v37  ;;  %v2366_v48 = vmax.f32 %v2238_v35, 0.0  ;;  %v1851_v14 = vadd.f32 %v3724_v7, %v515_v57  ;;  %v1849_v23 = vadd.f32 %v1698_v16, %v513_v1 }
 0x165   : > { %1910 = vst.msk [vmem:[#allocation2 + $0x1a0] sm:$0xff] %vm264_vm2, %v1781_v22  ;;  %v2175_v44 = vadd.f32 %v4539_v62, %v2040_v38  ;;  %v2104_v45 = vld [vmem:[#allocation2 + $0x398] sm:$0xff]  ;;  %v2038_v46 = vld [vmem:[#allocation2 + $0x188] sm:$0xff]  ;;  %1974 = vst.msk [vmem:[#allocation2 + $0x3a0] sm:$0xff] %vm264_vm2, %v1845_v30  ;;  %v2300_v34 = vmax.f32 %v2172_v36, 0.0  ;;  %v3454_v53 = vpack.c.bf16 %v2302_v42, %v2302_v42  ;;  %v3661_v17 = vpop.f32.mrb[58].mxu0 }
 0x166   : > { %3002 = vst.msk [vmem:[%s4326_s29 + $0x1b4] sm:$0xf] %vm2892_vm4, %v3513_v26  ;;  %v2239_v49 = vadd.f32 %v4539_v62, %v2104_v45  ;;  %v2173_v50 = vadd.f32 %v4539_v62, %v2038_v46  ;;  %v2102_v51 = vld [vmem:[#allocation2 + $0x388] sm:$0xff]  ;;  %v2364_v54 = vmax.f32 %v2236_v43, 0.0  ;;  %v3518_v59 = vpack.c.bf16 %v2366_v48, %v2366_v48  ;;  %v516_v9 = vld [vmem:[#allocation2 + $0x3d8] sm:$0xff]  ;;  %v3725_v25 = vpop.f32.mrb[58].mxu1 }
 0x167   : > { %1913 = vst.msk [vmem:[#allocation2 + $0x1b8] sm:$0xff] %vm264_vm2, %v1784_v31  ;;  %1977 = vst.msk [vmem:[#allocation2 + $0x3b8] sm:$0xff] %vm264_vm2, %v1848_v39  ;;  %v2303_v55 = vmax.f32 %v2175_v44, 0.0  ;;  %v2237_v56 = vadd.f32 %v4539_v62, %v2102_v51  ;;  %v3452_v60 = vpack.c.bf16 %v2300_v34, %v2300_v34  ;;  %v450_v10 = vld [vmem:[#allocation2 + $0x1c8] sm:$0xff]  ;;  %v1788_v24 = vadd.f32 %v3661_v17, %v452_v2  ;;  %v1445_v26 = vpop.f32.mrb[59].mxu0  ;;  %v1701_v33 = vpop.f32.mrb[59].mxu1 }
 0x168   : > { %1911 = vst.msk [vmem:[#allocation2 + $0x1a8] sm:$0xff] %vm264_vm2, %v1782_v40  ;;  %1975 = vst.msk [vmem:[#allocation2 + $0x3a8] sm:$0xff] %vm264_vm2, %v1846_v47  ;;  %v2367_v61 = vmax.f32 %v2239_v49, 0.0  ;;  %v2301_v63 = vmax.f32 %v2173_v50, 0.0  ;;  %v3516_v3 = vpack.c.bf16 %v2364_v54, %v2364_v54  ;;  %v514_v18 = vld [vmem:[#allocation2 + $0x3c8] sm:$0xff]  ;;  %v1852_v31 = vadd.f32 %v3725_v25, %v516_v9  ;;  %v455_v46 = vld [vmem:[#allocation2 + $0x1f0] sm:$0xff] }
 0x169   : > { %2943 = vst.msk [vmem:[%s4326_s29 + $0xc8] sm:$0xf] %vm2892_vm4, %v3454_v53  ;;  %v3455_v4 = vpack.c.bf16 %v2303_v55, %v2303_v55  ;;  %v2365_v5 = vmax.f32 %v2237_v56, 0.0  ;;  %3007 = vst.msk [vmem:[%s4326_s29 + $0x1c8] sm:$0xf] %vm2892_vm4, %v3518_v59  ;;  %v1786_v32 = vadd.f32 %v1445_v26, %v450_v10  ;;  %v1850_v40 = vadd.f32 %v1701_v33, %v514_v18  ;;  %v519_v50 = vld [vmem:[#allocation2 + $0x3f0] sm:$0xff] }
 0x16a   : > { %2941 = vst.msk [vmem:[%s4326_s29 + $0xc0] sm:$0xf] %vm2892_vm4, %v3452_v60  ;;  %v3519_v11 = vpack.c.bf16 %v2367_v61, %v2367_v61  ;;  %v3453_v12 = vpack.c.bf16 %v2301_v63, %v2301_v63  ;;  %v2043_v13 = vld [vmem:[#allocation2 + $0x1b0] sm:$0xff]  ;;  %3005 = vst.msk [vmem:[%s4326_s29 + $0x1c0] sm:$0xf] %vm2892_vm4, %v3516_v3  ;;  %v453_v51 = vld [vmem:[#allocation2 + $0x1e0] sm:$0xff] }
 0x16b   : > { %2944 = vst.msk [vmem:[%s4326_s29 + $0xcc] sm:$0xf] %vm2892_vm4, %v3455_v4  ;;  %v3517_v19 = vpack.c.bf16 %v2365_v5, %v2365_v5  ;;  %v2178_v20 = vadd.f32 %v4539_v62, %v2043_v13  ;;  %v2107_v21 = vld [vmem:[#allocation2 + $0x3b0] sm:$0xff]  ;;  %v3664_v56 = vpop.f32.mrb[60].mxu0  ;;  %v517_v57 = vld [vmem:[#allocation2 + $0x3e0] sm:$0xff]  ;;  %v456_v58 = vld [vmem:[#allocation2 + $0x1f8] sm:$0xff] }
 0x16c   : > { %v2041_v22 = vld [vmem:[#allocation2 + $0x1a0] sm:$0xff]  ;;  %1916 = vst.msk [vmem:[#allocation2 + $0x1d0] sm:$0xff] %vm264_vm2, %v1787_v6  ;;  %v2242_v27 = vadd.f32 %v4539_v62, %v2107_v21  ;;  %1980 = vst.msk [vmem:[#allocation2 + $0x3d0] sm:$0xff] %vm264_vm2, %v1851_v14  ;;  %v1791_v63 = vadd.f32 %v3664_v56, %v455_v46  ;;  %v3728_v0 = vpop.f32.mrb[60].mxu1  ;;  %v1458_v1 = vpop.f32.mrb[61].mxu0  ;;  %v520_v2 = vld [vmem:[#allocation2 + $0x3f8] sm:$0xff] }
 0x16d   : > { %3008 = vst.msk [vmem:[%s4326_s29 + $0x1cc] sm:$0xf] %vm2892_vm4, %v3519_v11  ;;  %2942 = vst.msk [vmem:[%s4326_s29 + $0xc4] sm:$0xf] %vm2892_vm4, %v3453_v12  ;;  %v2176_v28 = vadd.f32 %v4539_v62, %v2041_v22  ;;  %v2105_v29 = vld [vmem:[#allocation2 + $0x3a0] sm:$0xff]  ;;  %v2306_v35 = vmax.f32 %v2178_v20, 0.0  ;;  %v1855_v7 = vadd.f32 %v3728_v0, %v519_v50  ;;  %v1789_v8 = vadd.f32 %v1458_v1, %v453_v51 }
 0x16e   : > { %v2044_v30 = vld [vmem:[#allocation2 + $0x1b8] sm:$0xff]  ;;  %1914 = vst.msk [vmem:[#allocation2 + $0x1c0] sm:$0xff] %vm264_vm2, %v1785_v15  ;;  %v2240_v36 = vadd.f32 %v4539_v62, %v2105_v29  ;;  %1978 = vst.msk [vmem:[#allocation2 + $0x3c0] sm:$0xff] %vm264_vm2, %v1849_v23  ;;  %v2370_v41 = vmax.f32 %v2242_v27, 0.0  ;;  %v454_v3 = vld [vmem:[#allocation2 + $0x1e8] sm:$0xff]  ;;  %v1714_v9 = vpop.f32.mrb[61].mxu1 }
 0x16f   : > { %3006 = vst.msk [vmem:[%s4326_s29 + $0x1c4] sm:$0xf] %vm2892_vm4, %v3517_v19  ;;  %v2179_v37 = vadd.f32 %v4539_v62, %v2044_v30  ;;  %v2108_v38 = vld [vmem:[#allocation2 + $0x3b8] sm:$0xff]  ;;  %v2042_v39 = vld [vmem:[#allocation2 + $0x1a8] sm:$0xff]  ;;  %v2304_v42 = vmax.f32 %v2176_v28, 0.0  ;;  %v3458_v47 = vpack.c.bf16 %v2306_v35, %v2306_v35  ;;  %v3665_v10 = vpop.f32.mrb[62].mxu0  ;;  %v1853_v16 = vadd.f32 %v1714_v9, %v517_v57 }
 0x170   : > { %1917 = vst.msk [vmem:[#allocation2 + $0x1d8] sm:$0xff] %vm264_vm2, %v1788_v24  ;;  %v2243_v43 = vadd.f32 %v4539_v62, %v2108_v38  ;;  %v2177_v44 = vadd.f32 %v4539_v62, %v2042_v39  ;;  %v2106_v45 = vld [vmem:[#allocation2 + $0x3a8] sm:$0xff]  ;;  %1981 = vst.msk [vmem:[#allocation2 + $0x3d8] sm:$0xff] %vm264_vm2, %v1852_v31  ;;  %v2368_v48 = vmax.f32 %v2240_v36, 0.0  ;;  %v3522_v52 = vpack.c.bf16 %v2370_v41, %v2370_v41  ;;  %v3729_v18 = vpop.f32.mrb[62].mxu1  ;;  %v1461_v19 = vpop.f32.mrb[63].mxu0 }
 0x171   : > { %1915 = vst.msk [vmem:[#allocation2 + $0x1c8] sm:$0xff] %vm264_vm2, %v1786_v32  ;;  %v2307_v34 = vmax.f32 %v2179_v37, 0.0  ;;  %v2241_v49 = vadd.f32 %v4539_v62, %v2106_v45  ;;  %1979 = vst.msk [vmem:[#allocation2 + $0x3c8] sm:$0xff] %vm264_vm2, %v1850_v40  ;;  %v3456_v53 = vpack.c.bf16 %v2304_v42, %v2304_v42  ;;  %v518_v11 = vld [vmem:[#allocation2 + $0x3e8] sm:$0xff]  ;;  %v1792_v17 = vadd.f32 %v3665_v10, %v456_v58  ;;  %v4774_v20 = vld [vmem:[%s4843_s2] ss:$0 sm:$0xff] }
 0x172   : > { %v2371_v54 = vmax.f32 %v2243_v43, 0.0  ;;  %v2305_v55 = vmax.f32 %v2177_v44, 0.0  ;;  %2947 = vst.msk [vmem:[%s4326_s29 + $0xd8] sm:$0xf] %vm2892_vm4, %v3458_v47  ;;  %v3520_v59 = vpack.c.bf16 %v2368_v48, %v2368_v48  ;;  %3011 = vst.msk [vmem:[%s4326_s29 + $0x1d8] sm:$0xf] %vm2892_vm4, %v3522_v52  ;;  %v1856_v24 = vadd.f32 %v3729_v18, %v520_v2 }
 0x173   : > { %v3459_v60 = vpack.c.bf16 %v2307_v34, %v2307_v34  ;;  %v2369_v61 = vmax.f32 %v2241_v49, 0.0  ;;  %2945 = vst.msk [vmem:[%s4326_s29 + $0xd0] sm:$0xf] %vm2892_vm4, %v3456_v53  ;;  %v2047_v6 = vld [vmem:[#allocation2 + $0x1d0] sm:$0xff]  ;;  %v1790_v25 = vadd.f32 %v1461_v19, %v454_v3  ;;  %v1717_v26 = vpop.f32.mrb[63].mxu1 }
 0x174   : > { %v3523_v4 = vpack.c.bf16 %v2371_v54, %v2371_v54  ;;  %v3457_v5 = vpack.c.bf16 %v2305_v55, %v2305_v55  ;;  %3009 = vst.msk [vmem:[%s4326_s29 + $0x1d0] sm:$0xf] %vm2892_vm4, %v3520_v59  ;;  %v2182_v13 = vadd.f32 %v4539_v62, %v2047_v6  ;;  %v2111_v14 = vld [vmem:[#allocation2 + $0x3d0] sm:$0xff]  ;;  %v1854_v32 = vadd.f32 %v1717_v26, %v518_v11 }
 0x175   : > { %2948 = vst.msk [vmem:[%s4326_s29 + $0xdc] sm:$0xf] %vm2892_vm4, %v3459_v60  ;;  %v3521_v12 = vpack.c.bf16 %v2369_v61, %v2369_v61  ;;  %v2045_v15 = vld [vmem:[#allocation2 + $0x1c0] sm:$0xff]  ;;  %v2246_v62 = vadd.f32 %v4774_v20, %v2111_v14 }
 0x176   : > { %1920 = vst.msk [vmem:[#allocation2 + $0x1f0] sm:$0xff] %vm264_vm2, %v1791_v63  ;;  %v2180_v21 = vadd.f32 %v4774_v20, %v2045_v15  ;;  %v2109_v22 = vld [vmem:[#allocation2 + $0x3c0] sm:$0xff]  ;;  %1984 = vst.msk [vmem:[#allocation2 + $0x3f0] sm:$0xff] %vm264_vm2, %v1855_v7  ;;  %v2310_v27 = vmax.f32 %v2182_v13, 0.0 }
 0x177   : > { %3012 = vst.msk [vmem:[%s4326_s29 + $0x1dc] sm:$0xf] %vm2892_vm4, %v3523_v4  ;;  %2946 = vst.msk [vmem:[%s4326_s29 + $0xd4] sm:$0xf] %vm2892_vm4, %v3457_v5  ;;  %v2048_v23 = vld [vmem:[#allocation2 + $0x1d8] sm:$0xff]  ;;  %v2244_v28 = vadd.f32 %v4774_v20, %v2109_v22  ;;  %v2374_v33 = vmax.f32 %v2246_v62, 0.0 }
 0x178   : > { %1918 = vst.msk [vmem:[#allocation2 + $0x1e0] sm:$0xff] %vm264_vm2, %v1789_v8  ;;  %v2183_v29 = vadd.f32 %v4774_v20, %v2048_v23  ;;  %v2112_v30 = vld [vmem:[#allocation2 + $0x3d8] sm:$0xff]  ;;  %v2046_v31 = vld [vmem:[#allocation2 + $0x1c8] sm:$0xff]  ;;  %1982 = vst.msk [vmem:[#allocation2 + $0x3e0] sm:$0xff] %vm264_vm2, %v1853_v16  ;;  %v2308_v35 = vmax.f32 %v2180_v21, 0.0  ;;  %v3462_v39 = vpack.c.bf16 %v2310_v27, %v2310_v27 }
 0x179   : > { %3010 = vst.msk [vmem:[%s4326_s29 + $0x1d4] sm:$0xf] %vm2892_vm4, %v3521_v12  ;;  %v2247_v36 = vadd.f32 %v4774_v20, %v2112_v30  ;;  %v2181_v37 = vadd.f32 %v4774_v20, %v2046_v31  ;;  %v2110_v38 = vld [vmem:[#allocation2 + $0x3c8] sm:$0xff]  ;;  %v2372_v40 = vmax.f32 %v2244_v28, 0.0  ;;  %v3526_v43 = vpack.c.bf16 %v2374_v33, %v2374_v33 }
 0x17a   : > { %1921 = vst.msk [vmem:[#allocation2 + $0x1f8] sm:$0xff] %vm264_vm2, %v1792_v17  ;;  %1985 = vst.msk [vmem:[#allocation2 + $0x3f8] sm:$0xff] %vm264_vm2, %v1856_v24  ;;  %v2311_v41 = vmax.f32 %v2183_v29, 0.0  ;;  %v2245_v42 = vadd.f32 %v4774_v20, %v2110_v38  ;;  %v3460_v44 = vpack.c.bf16 %v2308_v35, %v2308_v35 }
 0x17b   : > { %1919 = vst.msk [vmem:[#allocation2 + $0x1e8] sm:$0xff] %vm264_vm2, %v1790_v25  ;;  %1983 = vst.msk [vmem:[#allocation2 + $0x3e8] sm:$0xff] %vm264_vm2, %v1854_v32  ;;  %v2375_v45 = vmax.f32 %v2247_v36, 0.0  ;;  %v2309_v46 = vmax.f32 %v2181_v37, 0.0  ;;  %v3524_v47 = vpack.c.bf16 %v2372_v40, %v2372_v40 }
 0x17c   : > { %2951 = vst.msk [vmem:[%s4326_s29 + $0xe8] sm:$0xf] %vm2892_vm4, %v3462_v39  ;;  %v3463_v48 = vpack.c.bf16 %v2311_v41, %v2311_v41  ;;  %v2373_v34 = vmax.f32 %v2245_v42, 0.0  ;;  %3015 = vst.msk [vmem:[%s4326_s29 + $0x1e8] sm:$0xf] %vm2892_vm4, %v3526_v43 }
 0x17d   : > { %2949 = vst.msk [vmem:[%s4326_s29 + $0xe0] sm:$0xf] %vm2892_vm4, %v3460_v44  ;;  %v3527_v49 = vpack.c.bf16 %v2375_v45, %v2375_v45  ;;  %v3461_v50 = vpack.c.bf16 %v2309_v46, %v2309_v46  ;;  %v2051_v51 = vld [vmem:[#allocation2 + $0x1f0] sm:$0xff]  ;;  %3013 = vst.msk [vmem:[%s4326_s29 + $0x1e0] sm:$0xf] %vm2892_vm4, %v3524_v47 }
 0x17e   : > { %2952 = vst.msk [vmem:[%s4326_s29 + $0xec] sm:$0xf] %vm2892_vm4, %v3463_v48  ;;  %v3525_v52 = vpack.c.bf16 %v2373_v34, %v2373_v34  ;;  %v2186_v53 = vadd.f32 %v4774_v20, %v2051_v51  ;;  %v2115_v54 = vld [vmem:[#allocation2 + $0x3f0] sm:$0xff] }
 0x17f   : > { %v2049_v55 = vld [vmem:[#allocation2 + $0x1e0] sm:$0xff]  ;;  %3016 = vst.msk [vmem:[%s4326_s29 + $0x1ec] sm:$0xf] %vm2892_vm4, %v3527_v49  ;;  %2950 = vst.msk [vmem:[%s4326_s29 + $0xe4] sm:$0xf] %vm2892_vm4, %v3461_v50  ;;  %v2250_v56 = vadd.f32 %v4774_v20, %v2115_v54 }
 0x180   : > { %v2184_v57 = vadd.f32 %v4774_v20, %v2049_v55  ;;  %v2113_v58 = vld [vmem:[#allocation2 + $0x3e0] sm:$0xff]  ;;  %3014 = vst.msk [vmem:[%s4326_s29 + $0x1e4] sm:$0xf] %vm2892_vm4, %v3525_v52  ;;  %v2314_v60 = vmax.f32 %v2186_v53, 0.0 }
 0x181   : > { %v2052_v59 = vld [vmem:[#allocation2 + $0x1f8] sm:$0xff]  ;;  %v2248_v61 = vadd.f32 %v4774_v20, %v2113_v58  ;;  %v2378_v2 = vmax.f32 %v2250_v56, 0.0 }
 0x182   : > { %v2187_v63 = vadd.f32 %v4774_v20, %v2052_v59  ;;  %v2116_v0 = vld [vmem:[#allocation2 + $0x3f8] sm:$0xff]  ;;  %v2050_v1 = vld [vmem:[#allocation2 + $0x1e8] sm:$0xff]  ;;  %v2312_v3 = vmax.f32 %v2184_v57, 0.0  ;;  %v3466_v7 = vpack.c.bf16 %v2314_v60, %v2314_v60 }
 0x183   : > { %v2251_v4 = vadd.f32 %v4774_v20, %v2116_v0  ;;  %v2185_v5 = vadd.f32 %v4774_v20, %v2050_v1  ;;  %v2114_v6 = vld [vmem:[#allocation2 + $0x3e8] sm:$0xff]  ;;  %v2376_v8 = vmax.f32 %v2248_v61, 0.0  ;;  %v3530_v11 = vpack.c.bf16 %v2378_v2, %v2378_v2 }
 0x184   : > { %v2315_v9 = vmax.f32 %v2187_v63, 0.0  ;;  %v2249_v10 = vadd.f32 %v4774_v20, %v2114_v6  ;;  %v3464_v12 = vpack.c.bf16 %v2312_v3, %v2312_v3  ;;  %2955 = vst.msk [vmem:[%s4326_s29 + $0xf8] sm:$0xf] %vm2892_vm4, %v3466_v7 }
 0x185   : > { %v2379_v13 = vmax.f32 %v2251_v4, 0.0  ;;  %v2313_v14 = vmax.f32 %v2185_v5, 0.0  ;;  %v3528_v15 = vpack.c.bf16 %v2376_v8, %v2376_v8  ;;  %3019 = vst.msk [vmem:[%s4326_s29 + $0x1f8] sm:$0xf] %vm2892_vm4, %v3530_v11 }
 0x186   : > { %v3467_v16 = vpack.c.bf16 %v2315_v9, %v2315_v9  ;;  %v2377_v17 = vmax.f32 %v2249_v10, 0.0  ;;  %2953 = vst.msk [vmem:[%s4326_s29 + $0xf0] sm:$0xf] %vm2892_vm4, %v3464_v12 }
 0x187   : > { %v3531_v18 = vpack.c.bf16 %v2379_v13, %v2379_v13  ;;  %v3465_v19 = vpack.c.bf16 %v2313_v14, %v2313_v14  ;;  %3017 = vst.msk [vmem:[%s4326_s29 + $0x1f0] sm:$0xf] %vm2892_vm4, %v3528_v15 }
 0x188   : > { %2956 = vst.msk [vmem:[%s4326_s29 + $0xfc] sm:$0xf] %vm2892_vm4, %v3467_v16  ;;  %v3529_v20 = vpack.c.bf16 %v2377_v17, %v2377_v17 }
 0x189   : > { %3020 = vst.msk [vmem:[%s4326_s29 + $0x1fc] sm:$0xf] %vm2892_vm4, %v3531_v18  ;;  %2954 = vst.msk [vmem:[%s4326_s29 + $0xf4] sm:$0xf] %vm2892_vm4, %v3465_v19 }
 0x18a   : > { %3018 = vst.msk [vmem:[%s4326_s29 + $0x1f4] sm:$0xf] %vm2892_vm4, %v3529_v20 }
 0x18b PF: > { %s13_s14 = sadd.s32 1, %s3850_s14   ;;  %s4845_s12 = smov %s3846_s13 }
 0x18c   : > { %p10_p5 = scmp.ge.s32.totalorder %s13_s14, 10   ;;  %s4846_s13 = smov %s4848_s15 }
 0x18e   :  { %12 = sbr.rel (!%p10_p5) target bundleno = 2 (0x2), region = 76 }

</bundles_post_ra>
